<compile_context>
chip_gen: v6e
topology: v6e:2x2x1
jax: 0.10.0
libtpu: 0.0.40
codegen_flags: <defaults>
</compile_context>

<pallas_src>
import functools

import numpy as np
import jax
import jax.numpy as jnp
from jax import lax
from jax.experimental import pallas as pl
from jax.experimental.pallas import tpu as pltpu

LOG_2PI = float(np.log(2.0 * np.pi))


def _mdn_kernel(inp_ref, x_ref, wb1_ref, wb2_ref, out_ref, *,
                n_valid, tile_n, n_inp, n_hid, n_mix, inv_n):
    tile = pl.program_id(0)

    # zero the resident (1,1) accumulator on the first grid step
    @pl.when(tile == 0)
    def _():
        out_ref[...] = jnp.zeros_like(out_ref)

    # ---- layer 1: h = tanh(inp @ W1 + b1) ----------------------------------
    wb1 = wb1_ref[...]                               # (n_inp + 1, n_hid)
    b1 = wb1[n_inp:n_inp + 1, :]                     # (1, n_hid)
    inp = inp_ref[...]                               # (tile_n, n_inp)
    if n_inp == 1:
        # K=1 contraction -> pure VPU broadcast outer product (skip the MXU)
        pre = inp * wb1[0:1, :] + b1
    else:
        pre = jnp.dot(inp, wb1[0:n_inp, :],
                      preferred_element_type=jnp.float32) + b1
    h = jnp.tanh(pre)                                # (tile_n, n_hid)

    # ---- fused mixture head: one matmul for [logits | mu | log_sigma] ------
    wb2 = wb2_ref[...]                               # (n_hid + 1, 3K)
    p = jnp.dot(h, wb2[0:n_hid, :],
                preferred_element_type=jnp.float32) + wb2[n_hid:n_hid + 1, :]

    k = n_mix
    logits = p[:, 0:k]                               # (tile_n, K)
    mu = p[:, k:2 * k]                               # (tile_n, K)
    log_sg = p[:, 2 * k:3 * k]                       # (tile_n, K)  (= log sigma)

    # log-softmax over the mixture axis  ( == log(pi), no divide / log(pi) )
    lmax = jnp.max(logits, axis=1, keepdims=True)
    shifted = logits - lmax
    log_pi = shifted - jnp.log(jnp.sum(jnp.exp(shifted), axis=1, keepdims=True))

    # log N(x | mu, sigma) with sigma = exp(log_sg), kept fully in log space
    x = x_ref[...]                                   # (tile_n, 1) broadcasts over K
    z = (x - mu) * jnp.exp(-log_sg)
    log_normal = -0.5 * z * z - 0.5 * LOG_2PI - log_sg
    lw = log_normal + log_pi                         # (tile_n, K)

    # log-sum-exp over mixtures -> per-row NLL
    m = jnp.max(lw, axis=1, keepdims=True)
    mll = jnp.log(jnp.sum(jnp.exp(lw - m), axis=1, keepdims=True)) + m
    nll = -mll                                       # (tile_n, 1)

    # mask padded rows of the last tile, accumulate this tile's mean share
    row = tile * tile_n + lax.broadcasted_iota(jnp.int32, (tile_n, 1), 0)
    nll = jnp.where(row < n_valid, nll, 0.0)
    out_ref[...] += jnp.sum(nll, axis=0, keepdims=True) * inv_n


def mdn_forward(inp, x, params, *, tile_n=128):
    """inp: (N, n_inp) f32, x: (N,) f32, params = (wb1, wb2). Returns scalar mean NLL."""
    wb1, wb2 = params
    n, n_inp = inp.shape
    n_hid = wb1.shape[1]
    n_mix = wb2.shape[1] // 3

    num_tiles = pl.cdiv(n, tile_n)
    n_pad = num_tiles * tile_n

    inp_p = jnp.zeros((n_pad, n_inp), jnp.float32).at[:n].set(inp.astype(jnp.float32))
    x_p = jnp.zeros((n_pad, 1), jnp.float32).at[:n, 0].set(x.astype(jnp.float32))

    kernel = functools.partial(
        _mdn_kernel,
        n_valid=n, tile_n=tile_n, n_inp=n_inp,
        n_hid=n_hid, n_mix=n_mix, inv_n=1.0 / n)

    out = pl.pallas_call(
        kernel,
        out_shape=jax.ShapeDtypeStruct((1, 1), jnp.float32),
        grid=(num_tiles,),
        in_specs=[
            pl.BlockSpec((tile_n, n_inp), lambda i: (i, 0)),   # batch-tiled
            pl.BlockSpec((tile_n, 1), lambda i: (i, 0)),       # batch-tiled
            pl.BlockSpec(wb1.shape, lambda i: (0, 0)),         # resident weights
            pl.BlockSpec(wb2.shape, lambda i: (0, 0)),         # resident weights
        ],
        out_specs=pl.BlockSpec((1, 1), lambda i: (0, 0)),      # resident accumulator
        compiler_params=pltpu.CompilerParams(
            dimension_semantics=("arbitrary",)),               # reduction axis
    )(inp_p, x_p, wb1, wb2)
    return out[0, 0]


def init_params(key, n_inp=1, n_hid=24, n_mixtures=24):
    """PyTorch-Linear-style uniform init, packed as [W ; b] per layer."""
    k1, k2, k3, k4 = jax.random.split(key, 4)
    bound1 = 1.0 / np.sqrt(n_inp)
    bound2 = 1.0 / np.sqrt(n_hid)

    w1 = jax.random.uniform(k1, (n_inp, n_hid), jnp.float32, -bound1, bound1)
    b1 = jax.random.uniform(k2, (1, n_hid), jnp.float32, -bound1, bound1)
    w2 = jax.random.uniform(k3, (n_hid, 3 * n_mixtures), jnp.float32, -bound2, bound2)
    b2 = jax.random.uniform(k4, (1, 3 * n_mixtures), jnp.float32, -bound2, bound2)

    wb1 = jnp.concatenate([w1, b1], axis=0)      # (n_inp + 1, n_hid)
    wb2 = jnp.concatenate([w2, b2], axis=0)      # (n_hid + 1, 3K): [logits|mu|log_sg]
    return (wb1, wb2)


def mdn_forward_ref(inp, x, params):
    """Pure-JAX reference mirroring the PyTorch forward (softmax + log form)."""
    wb1, wb2 = params
    n_inp = inp.shape[1]
    n_hid = wb1.shape[1]
    k = wb2.shape[1] // 3
    w1, b1 = wb1[:n_inp], wb1[n_inp:]
    w2, b2 = wb2[:n_hid], wb2[n_hid:]

    h = jnp.tanh(inp @ w1 + b1)
    p = h @ w2 + b2
    logits, mu, log_sg = p[:, :k], p[:, k:2 * k], p[:, 2 * k:]
    sigma = jnp.exp(log_sg)
    pi = jax.nn.softmax(logits, axis=1)
    x2 = x[:, None]
    log_normal = -0.5 * ((x2 - mu) / sigma) ** 2 - 0.5 * LOG_2PI - jnp.log(sigma)
    lw = log_normal + jnp.log(pi)
    maxes = jnp.max(lw, axis=1, keepdims=True)
    mll = jnp.log(jnp.sum(jnp.exp(lw - maxes), axis=1)) + maxes[:, 0]
    return jnp.mean(-mll)


if __name__ == "__main__":
    key = jax.random.PRNGKey(0)
    k_inp, k_x, k_par = jax.random.split(key, 3)

    N, n_inp, n_hid, n_mixtures = 200, 1, 24, 24
    # matches the `torch.rand(...) * 30 - 15` style data of the original script
    inp = jax.random.uniform(k_inp, (N, n_inp), jnp.float32) * 30.0 - 15.0
    x = jax.random.uniform(k_x, (N,), jnp.float32) * 30.0 - 15.0

    params = init_params(k_par, n_inp, n_hid, n_mixtures)

    out = jax.block_until_ready(mdn_forward(inp, x, params, tile_n=128))
    ref = mdn_forward_ref(inp, x, params)

    assert np.isfinite(float(out)), "non-finite NLL"
    assert np.allclose(float(out), float(ref), rtol=1e-4, atol=1e-4), (float(out), float(ref))

    print("KERNEL_OK")
</pallas_src>

<mosaic_0001>
module attributes {stable_mosaic.version = 11 : i64} {
  func.func @_mdn_kernel(%arg0: i32, %arg1: memref<128x1xf32, #tpu.memory_space<vmem>>, %arg2: memref<128x1xf32, #tpu.memory_space<vmem>>, %arg3: memref<2x24xf32, #tpu.memory_space<vmem>>, %arg4: memref<25x72xf32, #tpu.memory_space<vmem>>, %arg5: memref<1x1xf32, #tpu.memory_space<vmem>>) attributes {dimension_semantics = [#tpu.dimension_semantics<arbitrary>], iteration_bounds = array<i64: 2>, scalar_prefetch = 0 : i64, scratch_operands = 0 : i64, tpu.core_type = #tpu.core_type<tc>, window_params = [{transform_indices = @transform_0, window_bounds = array<i64: 128, 1>}, {transform_indices = @transform_1, window_bounds = array<i64: 128, 1>}, {pipeline_mode = #tpu.pipeline_mode<synchronous>, transform_indices = @transform_2, window_bounds = array<i64: 2, 24>}, {pipeline_mode = #tpu.pipeline_mode<synchronous>, transform_indices = @transform_3, window_bounds = array<i64: 25, 72>}, {pipeline_mode = #tpu.pipeline_mode<synchronous>, transform_indices = @transform_4, window_bounds = array<i64: 1, 1>}]} {
    %c0_i32 = arith.constant 0 : i32
    %0 = arith.cmpi eq, %arg0, %c0_i32 : i32
    %1 = arith.extui %0 : i1 to i32
    %c0_i32_0 = arith.constant 0 : i32
    %2 = arith.cmpi ne, %1, %c0_i32_0 : i32
    scf.if %2 {
      %cst_23 = arith.constant 0.000000e+00 : f32
      %72 = vector.broadcast %cst_23 : f32 to vector<1x1xf32>
      %c0_24 = arith.constant 0 : index
      %c0_25 = arith.constant 0 : index
      %73 = vector.load %arg5[%c0_24, %c0_25] : memref<1x1xf32, #tpu.memory_space<vmem>>, vector<1x1xf32>
      tpu.vector_store %arg5[%c0_24, %c0_25], %72 {strides = array<i32>} : memref<1x1xf32, #tpu.memory_space<vmem>>, vector<1x1xf32>,
    } else {
    }
    %c0 = arith.constant 0 : index
    %c0_1 = arith.constant 0 : index
    %3 = vector.load %arg3[%c0, %c0_1] : memref<2x24xf32, #tpu.memory_space<vmem>>, vector<2x24xf32>
    %4 = vector.extract_strided_slice %3 {offsets = [1, 0], sizes = [1, 24], strides = [1, 1]} : vector<2x24xf32> to vector<1x24xf32>
    %c0_2 = arith.constant 0 : index
    %c0_3 = arith.constant 0 : index
    %5 = vector.load %arg1[%c0_2, %c0_3] : memref<128x1xf32, #tpu.memory_space<vmem>>, vector<128x1xf32>
    %6 = vector.extract_strided_slice %3 {offsets = [0, 0], sizes = [1, 24], strides = [1, 1]} : vector<2x24xf32> to vector<1x24xf32>
    %7 = vector.broadcast %5 : vector<128x1xf32> to vector<128x24xf32>
    %8 = vector.broadcast %6 : vector<1x24xf32> to vector<128x24xf32>
    %9 = arith.mulf %7, %8 : vector<128x24xf32>
    %10 = vector.broadcast %4 : vector<1x24xf32> to vector<128x24xf32>
    %11 = arith.addf %9, %10 : vector<128x24xf32>
    %12 = math.tanh %11 : vector<128x24xf32>
    %c0_4 = arith.constant 0 : index
    %c0_5 = arith.constant 0 : index
    %13 = vector.load %arg4[%c0_4, %c0_5] : memref<25x72xf32, #tpu.memory_space<vmem>>, vector<25x72xf32>
    %14 = vector.extract_strided_slice %13 {offsets = [0, 0], sizes = [24, 72], strides = [1, 1]} : vector<25x72xf32> to vector<24x72xf32>
    %cst = arith.constant dense<0.000000e+00> : vector<128x72xf32>
    %15 = tpu.matmul %12, %14, %cst {dimension_numbers = #tpu.dot_dimension_numbers<[1], [0], [0], [1], [0, 0, 1, 1], [], []>} : vector<128x24xf32>, vector<24x72xf32>, vector<128x72xf32> -> vector<128x72xf32>
    %16 = vector.extract_strided_slice %13 {offsets = [24, 0], sizes = [1, 72], strides = [1, 1]} : vector<25x72xf32> to vector<1x72xf32>
    %17 = vector.broadcast %16 : vector<1x72xf32> to vector<128x72xf32>
    %18 = arith.addf %15, %17 : vector<128x72xf32>
    %19 = vector.extract_strided_slice %18 {offsets = [0, 0], sizes = [128, 24], strides = [1, 1]} : vector<128x72xf32> to vector<128x24xf32>
    %20 = vector.extract_strided_slice %18 {offsets = [0, 24], sizes = [128, 24], strides = [1, 1]} : vector<128x72xf32> to vector<128x24xf32>
    %21 = vector.extract_strided_slice %18 {offsets = [0, 48], sizes = [128, 24], strides = [1, 1]} : vector<128x72xf32> to vector<128x24xf32>
    %cst_6 = arith.constant dense<0xFF800000> : vector<128xf32>
    %22 = vector.multi_reduction <maximumf>, %19, %cst_6 [1] : vector<128x24xf32> to vector<128xf32>
    %23 = vector.shape_cast %22 : vector<128xf32> to vector<128x1xf32>
    %24 = vector.broadcast %23 : vector<128x1xf32> to vector<128x24xf32>
    %25 = arith.subf %19, %24 : vector<128x24xf32>
    %26 = math.exp %25 : vector<128x24xf32>
    %cst_7 = arith.constant dense<0.000000e+00> : vector<128xf32>
    %27 = vector.multi_reduction <add>, %26, %cst_7 [1] : vector<128x24xf32> to vector<128xf32>
    %28 = vector.shape_cast %27 : vector<128xf32> to vector<128x1xf32>
    %29 = math.log %28 : vector<128x1xf32>
    %30 = vector.broadcast %29 : vector<128x1xf32> to vector<128x24xf32>
    %31 = arith.subf %25, %30 : vector<128x24xf32>
    %c0_8 = arith.constant 0 : index
    %c0_9 = arith.constant 0 : index
    %32 = vector.load %arg2[%c0_8, %c0_9] : memref<128x1xf32, #tpu.memory_space<vmem>>, vector<128x1xf32>
    %33 = vector.broadcast %32 : vector<128x1xf32> to vector<128x24xf32>
    %34 = arith.subf %33, %20 : vector<128x24xf32>
    %cst_10 = arith.constant 0.000000e+00 : f32
    %35 = vector.broadcast %cst_10 : f32 to vector<128x24xf32>
    %36 = arith.subf %35, %21 : vector<128x24xf32>
    %37 = math.exp %36 : vector<128x24xf32>
    %38 = arith.mulf %34, %37 : vector<128x24xf32>
    %cst_11 = arith.constant -5.000000e-01 : f32
    %39 = vector.broadcast %cst_11 : f32 to vector<128x24xf32>
    %40 = arith.mulf %39, %38 : vector<128x24xf32>
    %41 = arith.mulf %40, %38 : vector<128x24xf32>
    %cst_12 = arith.constant 0.918938517 : f32
    %42 = vector.broadcast %cst_12 : f32 to vector<128x24xf32>
    %43 = arith.subf %41, %42 : vector<128x24xf32>
    %44 = arith.subf %43, %21 : vector<128x24xf32>
    %45 = arith.addf %44, %31 : vector<128x24xf32>
    %cst_13 = arith.constant dense<0xFF800000> : vector<128xf32>
    %46 = vector.multi_reduction <maximumf>, %45, %cst_13 [1] : vector<128x24xf32> to vector<128xf32>
    %47 = vector.shape_cast %46 : vector<128xf32> to vector<128x1xf32>
    %48 = vector.broadcast %47 : vector<128x1xf32> to vector<128x24xf32>
    %49 = arith.subf %45, %48 : vector<128x24xf32>
    %50 = math.exp %49 : vector<128x24xf32>
    %cst_14 = arith.constant dense<0.000000e+00> : vector<128xf32>
    %51 = vector.multi_reduction <add>, %50, %cst_14 [1] : vector<128x24xf32> to vector<128xf32>
    %52 = vector.shape_cast %51 : vector<128xf32> to vector<128x1xf32>
    %53 = math.log %52 : vector<128x1xf32>
    %54 = arith.addf %53, %47 : vector<128x1xf32>
    %cst_15 = arith.constant 0.000000e+00 : f32
    %55 = vector.broadcast %cst_15 : f32 to vector<128x1xf32>
    %56 = arith.subf %55, %54 : vector<128x1xf32>
    %c128_i32 = arith.constant 128 : i32
    %57 = arith.muli %arg0, %c128_i32 : i32
    %58 = tpu.iota {dimensions = array<i32: 0>} : vector<128x1xi32>
    %59 = vector.broadcast %57 : i32 to vector<128x1xi32>
    %60 = arith.addi %59, %58 : vector<128x1xi32>
    %c200_i32 = arith.constant 200 : i32
    %61 = vector.broadcast %c200_i32 : i32 to vector<128x1xi32>
    %62 = arith.cmpi slt, %60, %61 : vector<128x1xi32>
    %cst_16 = arith.constant 0.000000e+00 : f32
    %63 = vector.broadcast %cst_16 : f32 to vector<128x1xf32>
    %64 = arith.select %62, %56, %63 : vector<128x1xi1>, vector<128x1xf32>
    %c0_17 = arith.constant 0 : index
    %c0_18 = arith.constant 0 : index
    %65 = vector.load %arg5[%c0_17, %c0_18] : memref<1x1xf32, #tpu.memory_space<vmem>>, vector<1x1xf32>
    %cst_19 = arith.constant dense<0.000000e+00> : vector<1xf32>
    %66 = vector.multi_reduction <add>, %64, %cst_19 [0] : vector<128x1xf32> to vector<1xf32>
    %67 = vector.shape_cast %66 : vector<1xf32> to vector<1x1xf32>
    %cst_20 = arith.constant 5.000000e-03 : f32
    %68 = vector.broadcast %cst_20 : f32 to vector<1x1xf32>
    %69 = arith.mulf %67, %68 : vector<1x1xf32>
    %70 = arith.addf %65, %69 : vector<1x1xf32>
    %c0_21 = arith.constant 0 : index
    %c0_22 = arith.constant 0 : index
    %71 = vector.load %arg5[%c0_21, %c0_22] : memref<1x1xf32, #tpu.memory_space<vmem>>, vector<1x1xf32>
    tpu.vector_store %arg5[%c0_21, %c0_22], %70 {strides = array<i32>} : memref<1x1xf32, #tpu.memory_space<vmem>>, vector<1x1xf32>,
    return
  }
  func.func @transform_0(%arg0: i32) -> (i32, i32) {
    %c0_i32 = arith.constant 0 : i32
    %c0_i32_0 = arith.constant 0 : i32
    return %arg0, %c0_i32 : i32, i32
  }
  func.func @transform_1(%arg0: i32) -> (i32, i32) {
    %c0_i32 = arith.constant 0 : i32
    %c0_i32_0 = arith.constant 0 : i32
    return %arg0, %c0_i32 : i32, i32
  }
  func.func @transform_2(%arg0: i32) -> (i32, i32) {
    %c0_i32 = arith.constant 0 : i32
    %c0_i32_0 = arith.constant 0 : i32
    %c0_i32_1 = arith.constant 0 : i32
    return %c0_i32, %c0_i32_0 : i32, i32
  }
  func.func @transform_3(%arg0: i32) -> (i32, i32) {
    %c0_i32 = arith.constant 0 : i32
    %c0_i32_0 = arith.constant 0 : i32
    %c0_i32_1 = arith.constant 0 : i32
    return %c0_i32, %c0_i32_0 : i32, i32
  }
  func.func @transform_4(%arg0: i32) -> (i32, i32) {
    %c0_i32 = arith.constant 0 : i32
    %c0_i32_0 = arith.constant 0 : i32
    %c0_i32_1 = arith.constant 0 : i32
    return %c0_i32, %c0_i32_0 : i32, i32
  }
}

</mosaic_0001>

<bundles_post_ra>
// kernel: tpu_custom_call.1
= control target key start
LH: loop header
LB: loop body
LE: loop exit
PB: predicated region body
PF: predicated region fallthrough
CT: control target
= control target key end

     0   :  { %9 = vsyncpa [#allocation3], 0  ;;  %s2014_s15 = smov 0   ;;  %s2790_s0 = inlined_call_operand.vmem [shape: f32[256,1], index: 0, kind: input, shape index: {}]   ;;  %s2791_s1 = inlined_call_operand.vmem [shape: f32[256,1], index: 1, kind: input, shape index: {}]   ;;  %s2792_s2 = inlined_call_operand.vmem [shape: f32[2,24], index: 2, kind: input, shape index: {}]   ;;  %s2793_s3 = inlined_call_operand.vmem [shape: f32[25,72], index: 3, kind: input, shape index: {}]   ;;  %s2794_s4 = inlined_call_operand.hbm [shape: f32[1,1], index: 4, kind: output, shape index: {}]  }
   0x1 LB: > { %s2020_s16 = sadd.s32 4294967295, %s1982_s15   ;;  %p1636_p0 = scmp.ge.s32.totalorder %s1982_s15, 1  ;;  %s1982_s15 = sphi %s2014_s15, %s15_s15  }
   0x2   : > { %p170_p1 = scmp.lt.s32.totalorder %s1982_s15, 3 }
   0x4   : > { %p171_p2 = pnand %p1636_p0, %p170_p1 }
   0x6   : > { %174 = sbr.rel (%p171_p2) target bundleno = 1507 (0x5e3), region = 36 }
   0xb   : > { %s1637_s17 = sshll.u32 %s2020_s16, 4  ;;  %p1641_p4 = scmp.ne.s32.totalorder %s2020_s16, 0 }
   0xc   : > { %p197_p3 = scmp.lt.s32.totalorder %s1637_s17, 31 }
   0xd   : > { %211 = sbr.rel (%p1641_p4) target bundleno = 20 (0x14), region = 40 }
   0xe   : > { %s2829_s17 = smov (!%p197_p3, %s1637_s17), 31 }
   0xf   : > { %s1638_s18 = sshll.u32 %s2829_s17, 3 }
  0x10   : > { %s2028_s21 = scalar_lea.vmem %s2790_s0, %s1638_s18  ;;  %s2033_s24 = scalar_lea.vmem %s2791_s1, %s1638_s18 }
  0x12   : > { %vm212_vm0 = vcmask 0   ;;  %v1984_v0 = vmov 0.0  }
  0x13   : > { %213 = vst.msk [vmem:[#allocation2] sm:$0x1] %vm212_vm0, %v1984_v0 }
  0x14 PF: > { %v217_v1 = vld [vmem:[%s2028_s21 + $0x10] sm:$0xff]  ;;  %v215_v2 = vld [vmem:[%s2028_s21] sm:$0xff]  ;;  %v1985_v3 = vmov 0   ;;  %v218_v4 = vld [vmem:[%s2028_s21 + $0x18] sm:$0xff]  ;;  %v311_v35 = vlaneseq  ;;  %vm375_vm1 = vcmask 195584   ;;  %s1986_s9 = smov 104  }
  0x15   : > { %1755 = vset.pattern.permute.xlu1 %v1985_v3  ;;  %1754 = vset.pattern.permute.xlu0 %v1985_v3  ;;  %v216_v5 = vld [vmem:[%s2028_s21 + $0x8] sm:$0xff]  ;;  %v219_v7 = vld [vmem:[%s2028_s21 + $0x20] sm:$0xff]  ;;  %v222_v8 = vld [vmem:[%s2028_s21 + $0x38] sm:$0xff]  ;;  %s1987_s10 = smov 24   ;;  %vm1209_vm2 = vcmask 392384   ;;  %s1675_s11 = sshll.u32 %s2020_s16, 7 }
  0x16   : > { %243 = vperm.xlu1 %1755, %v217_v1   ;;  %233 = vperm.xlu0 %1754, %v215_v2   ;;  %v220_v6 = vld [vmem:[%s2028_s21 + $0x28] sm:$0xff]  ;;  %v221_v9 = vld [vmem:[%s2028_s21 + $0x30] sm:$0xff]  ;;  %v223_v12 = vld [vmem:[%s2028_s21 + $0x40] sm:$0xff]  ;;  %v2075_v36 = vshrl.u32 %v311_v35, 7  ;;  %s1988_s12 = smov [#allocation2]   ;;  %p1739_p5 = scmp.eq.s32.totalorder %s2020_s16, 1 }
  0x17   : > { %v369_v10 = vld [vmem:[%s2793_s3 + $0x10] sm:$0xff]  ;;  %v224_v11 = vld [vmem:[%s2028_s21 + $0x48] sm:$0xff]  ;;  %v367_v14 = vld [vmem:[%s2793_s3] sm:$0xff]  ;;  %s1582_s13 = sshll.u32 %s1988_s12, 4  ;;  %s1583_s13 = int_to_ptr.vmem [resolvable:$true] %s1582_s13 }
  0x18   : > { %1699 = vmatprep.subr.mxu0 %v369_v10  ;;  %1729 = vmatprep.subr.mxu1 %v369_v10  ;;  %v368_v13 = vld [vmem:[%s2793_s3 + $0x8] sm:$0xff]  ;;  %v226_v15 = vld [vmem:[%s2028_s21 + $0x58] sm:$0xff]  ;;  %v225_v16 = vld [vmem:[%s2028_s21 + $0x50] sm:$0xff]  ;;  %2798 = vst [vmem:[#allocation5_spill] sm:$0xff] %v2075_v36  ;;  %v313_v37 = vsub.s32 0, %v2075_v36  ;;  %v333_v39 = vsub.s32 1, %v2075_v36  ;;  %p1955_p9 = scmp.lt.s32.totalorder %s1583_s13, %s1583_s13 }
  0x19   : > { %1700 = vmatpush3.msra.mxu0 %v369_v10  ;;  %1732 = vmatpush3.msra.mxu1 %v369_v10  ;;  %v228_v17 = vld [vmem:[%s2028_s21 + $0x68] sm:$0xff]  ;;  %v227_v18 = vld [vmem:[%s2028_s21 + $0x60] sm:$0xff]  ;;  %v230_v19 = vld [vmem:[%s2028_s21 + $0x78] sm:$0xff]  ;;  %s1948_s14 = scalar_lea.vmem %s1583_s13, 16  ;;  %s1954_s17 = scalar_lea.vmem %s1583_s13, 32 }
  0x1a   : > { %248 = vperm.xlu1 %1755, %v218_v4   ;;  %238 = vperm.xlu0 %1754, %v216_v5   ;;  %v229_v20 = vld [vmem:[%s2028_s21 + $0x70] sm:$0xff]  ;;  %v761_v21 = vld [vmem:[%s2033_s24] sm:$0xff]  ;;  %v762_v22 = vld [vmem:[%s2033_s24 + $0x8] sm:$0xff]  ;;  %p1949_p6 = scmp.ne.s32.totalorder %s1583_s13, %s1948_s14  ;;  %p1956_p10 = scmp.lt.s32.totalorder %s1954_s17, %s1948_s14 }
  0x1b   : > { %1701 = vmatprep.subr.mxu0 %v368_v13  ;;  %1730 = vmatprep.subr.mxu1 %v368_v13  ;;  %v763_v23 = vld [vmem:[%s2033_s24 + $0x10] sm:$0xff]  ;;  %v765_v24 = vld [vmem:[%s2033_s24 + $0x20] sm:$0xff]  ;;  %v764_v25 = vld [vmem:[%s2033_s24 + $0x18] sm:$0xff] }
  0x1c   : > { %1702 = vmatpush3.msra.mxu0 %v368_v13  ;;  %1733 = vmatpush3.msra.mxu1 %v368_v13  ;;  %v771_v26 = vld [vmem:[%s2033_s24 + $0x50] sm:$0xff]  ;;  %v766_v27 = vld [vmem:[%s2033_s24 + $0x28] sm:$0xff]  ;;  %v772_v28 = vld [vmem:[%s2033_s24 + $0x58] sm:$0xff]  ;;  %p1950_p7 = pnand %p1949_p6, %p1739_p5  ;;  %p1957_p11 = por %p1956_p10, %p1955_p9 }
  0x1d   : > { %1703 = vmatprep.subr.mxu0 %v367_v14  ;;  %1731 = vmatprep.subr.mxu1 %v367_v14  ;;  %v767_v29 = vld [vmem:[%s2033_s24 + $0x30] sm:$0xff]  ;;  %v773_v30 = vld [vmem:[%s2033_s24 + $0x60] sm:$0xff]  ;;  %v768_v31 = vld [vmem:[%s2033_s24 + $0x38] sm:$0xff] }
  0x1e   : > { %258 = vperm.xlu1 %1755, %v220_v6   ;;  %253 = vperm.xlu0 %1754, %v219_v7   ;;  %v774_v32 = vld [vmem:[%s2033_s24 + $0x68] sm:$0xff]  ;;  %v769_v33 = vld [vmem:[%s2033_s24 + $0x40] sm:$0xff]  ;;  %p1951_p8 = pneg %p1950_p7 }
  0x1f   : > { %1704 = vmatpush3.msra.mxu0 %v367_v14  ;;  %1734 = vmatpush3.msra.mxu1 %v367_v14  ;;  %v770_v34 = vld [vmem:[%s2033_s24 + $0x48] sm:$0xff]  ;;  %v214_v38 = vld [vmem:[%s2792_s2] sm:$0x3] }
  0x20   : > { %v2082_v40 = vrot.slane %v214_v38, %v313_v37  ;;  %v2084_v41 = vrot.slane %v214_v38, %v333_v39  ;;  %p1958_p12 = pnand %p1957_p11, %p1951_p8 }
  0x22   : > { %268 = vperm.xlu1 %1755, %v222_v8   ;;  %263 = vperm.xlu0 %1754, %v221_v9  }
  0x26   : > { %278 = vperm.xlu1 %1755, %v224_v11   ;;  %273 = vperm.xlu0 %1754, %v223_v12  }
  0x2a   : > { %288 = vperm.xlu1 %1755, %v226_v15   ;;  %283 = vperm.xlu0 %1754, %v225_v16  }
  0x2e   : > { %298 = vperm.xlu1 %1755, %v228_v17   ;;  %293 = vperm.xlu0 %1754, %v227_v18  }
  0x32   : > { %308 = vperm.xlu1 %1755, %v230_v19   ;;  %303 = vperm.xlu0 %1754, %v229_v20  }
  0x36   : > { %779 = vperm.xlu1 %1755, %v761_v21   ;;  %784 = vperm.xlu0 %1754, %v762_v22  }
  0x3a   : > { %789 = vperm.xlu1 %1755, %v763_v23   ;;  %799 = vperm.xlu0 %1754, %v765_v24  }
  0x3e   : > { %794 = vperm.xlu1 %1755, %v764_v25   ;;  %829 = vperm.xlu0 %1754, %v771_v26  }
  0x42   : > { %804 = vperm.xlu1 %1755, %v766_v27   ;;  %834 = vperm.xlu0 %1754, %v772_v28  }
  0x46   : > { %809 = vperm.xlu1 %1755, %v767_v29   ;;  %839 = vperm.xlu0 %1754, %v773_v30  }
  0x4a   : > { %814 = vperm.xlu1 %1755, %v768_v31   ;;  %844 = vperm.xlu0 %1754, %v774_v32  }
  0x4e   : > { %819 = vperm.xlu1 %1755, %v769_v33  }
  0x52   : > { %824 = vperm.xlu1 %1755, %v770_v34  }
  0x91   : > { %v244_v42 = vpop.permute.xlu1 %243  ;;  %v234_v43 = vpop.permute.xlu0 %233 }
  0x92   : > { %v317_v44 = vmul.f32 %v2082_v40, %v244_v42  ;;  %v315_v45 = vmul.f32 %v2082_v40, %v234_v43  ;;  %v2137_v43 = vld [vmem:[%s2793_s3 + $0x18] ss:$0 sm:$0xff] }
  0x94   : > { %v335_v46 = vadd.f32 %v2084_v41, %v315_v45  ;;  %v337_v49 = vadd.f32 %v2084_v41, %v317_v44 }
  0x95   : > { %v249_v47 = vpop.permute.xlu1 %248  ;;  %v239_v48 = vpop.permute.xlu0 %238 }
  0x96   : > { %v318_v50 = vmul.f32 %v2082_v40, %v249_v47  ;;  %v316_v51 = vmul.f32 %v2082_v40, %v239_v48  ;;  %1756 = vtanh.f32 %v335_v46 }
  0x97   : > { %1758 = vtanh.f32 %v337_v49 }
  0x98   : > { %v336_v52 = vadd.f32 %v2084_v41, %v316_v51  ;;  %v338_v53 = vadd.f32 %v2084_v41, %v318_v50 }
  0x99   : > { %v259_v54 = vpop.permute.xlu1 %258  ;;  %v254_v55 = vpop.permute.xlu0 %253 }
  0x9a   : > { %v320_v56 = vmul.f32 %v2082_v40, %v259_v54  ;;  %v319_v57 = vmul.f32 %v2082_v40, %v254_v55  ;;  %1760 = vtanh.f32 %v336_v52 }
  0x9b   : > { %1762 = vtanh.f32 %v338_v53 }
  0x9c   : > { %v339_v58 = vadd.f32 %v2084_v41, %v319_v57  ;;  %v340_v59 = vadd.f32 %v2084_v41, %v320_v56 }
  0x9d   : > { %v269_v60 = vpop.permute.xlu1 %268  ;;  %v264_v61 = vpop.permute.xlu0 %263 }
  0x9e   : > { %v322_v62 = vmul.f32 %v2082_v40, %v269_v60  ;;  %v321_v63 = vmul.f32 %v2082_v40, %v264_v61  ;;  %1764 = vtanh.f32 %v339_v58 }
  0x9f   : > { %1766 = vtanh.f32 %v340_v59 }
  0xa0   : > { %v341_v0 = vadd.f32 %v2084_v41, %v321_v63  ;;  %v342_v1 = vadd.f32 %v2084_v41, %v322_v62 }
  0xa1   : > { %v279_v2 = vpop.permute.xlu1 %278  ;;  %v274_v3 = vpop.permute.xlu0 %273 }
  0xa2   : > { %v324_v4 = vmul.f32 %v2082_v40, %v279_v2  ;;  %v323_v5 = vmul.f32 %v2082_v40, %v274_v3  ;;  %1768 = vtanh.f32 %v341_v0 }
  0xa3   : > { %v1757_v6 = vpop.eup %1756  ;;  %1770 = vtanh.f32 %v342_v1 }
  0xa4   : > { %v344_v7 = vadd.f32 %v2084_v41, %v324_v4  ;;  %v343_v8 = vadd.f32 %v2084_v41, %v323_v5  ;;  %1705 = vmatprep.mubr.msk.f32.mxu0 %vm375_vm1, %v1757_v6  ;;  %v1759_v13 = vpop.eup %1758 }
  0xa5   : > { %v289_v9 = vpop.permute.xlu1 %288  ;;  %v284_v10 = vpop.permute.xlu0 %283 }
  0xa6   : > { %1772 = vtanh.f32 %v344_v7  ;;  %v326_v11 = vmul.f32 %v2082_v40, %v289_v9  ;;  %v325_v12 = vmul.f32 %v2082_v40, %v284_v10 }
  0xa7   : > { %1774 = vtanh.f32 %v343_v8  ;;  %v1761_v14 = vpop.eup %1760 }
  0xa8   : > { %v346_v15 = vadd.f32 %v2084_v41, %v326_v11  ;;  %v345_v16 = vadd.f32 %v2084_v41, %v325_v12  ;;  %1706 = vmatmul.mubr.msk.f32.vlgmr.msra.gmra.mxu0 %vm375_vm1, %v1761_v14  ;;  %v1763_v19 = vpop.eup %1762 }
  0xa9   : > { %v299_v17 = vpop.permute.xlu1 %298  ;;  %v294_v18 = vpop.permute.xlu0 %293  ;;  %1708 = vmatprep.mubr.msk.f32.mxu0 %vm375_vm1, %v1759_v13 }
  0xaa   : > { %1776 = vtanh.f32 %v346_v15  ;;  %v328_v20 = vmul.f32 %v2082_v40, %v299_v17  ;;  %v327_v21 = vmul.f32 %v2082_v40, %v294_v18 }
  0xab   : > { %1778 = vtanh.f32 %v345_v16  ;;  %v1765_v22 = vpop.eup %1764 }
  0xac   : > { %v348_v23 = vadd.f32 %v2084_v41, %v328_v20  ;;  %v347_v24 = vadd.f32 %v2084_v41, %v327_v21  ;;  %1709 = vmatmul.mubr.msk.f32.gmra.mxu0 %vm375_vm1, %v1763_v19  ;;  %v1767_v27 = vpop.eup %1766 }
  0xad   : > { %v309_v25 = vpop.permute.xlu1 %308  ;;  %v304_v26 = vpop.permute.xlu0 %303  ;;  %1711 = vmatprep.mubr.msk.f32.mxu0 %vm375_vm1, %v1765_v22 }
  0xae   : > { %1780 = vtanh.f32 %v348_v23  ;;  %v330_v28 = vmul.f32 %v2082_v40, %v309_v25  ;;  %v329_v29 = vmul.f32 %v2082_v40, %v304_v26 }
  0xaf   : > { %1782 = vtanh.f32 %v347_v24  ;;  %v1769_v30 = vpop.eup %1768 }
  0xb0   : > { %v350_v31 = vadd.f32 %v2084_v41, %v330_v28  ;;  %v349_v32 = vadd.f32 %v2084_v41, %v329_v29  ;;  %1712 = vmatmul.mubr.msk.f32.gmra.mxu0 %vm375_vm1, %v1767_v27  ;;  %v1771_v33 = vpop.eup %1770 }
  0xb1   : > { %1714 = vmatprep.mubr.msk.f32.mxu0 %vm375_vm1, %v1769_v30  ;;  %v2220_v27 = vpop.permute.xlu0 %784 }
  0xb2   : > { %1784 = vtanh.f32 %v350_v31 }
  0xb3   : > { %v1773_v34 = vpop.eup %1772  ;;  %1786 = vtanh.f32 %v349_v32 }
  0xb4   : > { %v1775_v35 = vpop.eup %1774  ;;  %1715 = vmatmul.mubr.msk.f32.gmra.mxu0 %vm375_vm1, %v1771_v33  ;;  %v2227_v33 = vpop.permute.xlu1 %779 }
  0xb5   : > { %1717 = vmatprep.mubr.msk.f32.mxu1 %vm375_vm1, %v1775_v35 }
  0xb6   : > { %1718 = vmatmul.mubr.msk.f32.vlgmr.msra.gmra.mxu1 %vm375_vm1, %v1773_v34  ;;  %v2229_v34 = vpop.permute.xlu0 %799 }
  0xb7   : > { %v1777_v37 = vpop.eup %1776 }
  0xb8   : > { %v1779_v38 = vpop.eup %1778 }
  0xb9   : > { %1720 = vmatprep.mubr.msk.f32.mxu1 %vm375_vm1, %v1779_v38  ;;  %v2232_v38 = vpop.permute.xlu1 %789 }
  0xba   : > { %1721 = vmatmul.mubr.msk.f32.gmra.mxu1 %vm375_vm1, %v1777_v37 }
  0xbb   : > { %v1781_v39 = vpop.eup %1780 }
  0xbc   : > { %v1783_v40 = vpop.eup %1782 }
  0xbd   : > { %1723 = vmatprep.mubr.msk.f32.mxu1 %vm375_vm1, %v1783_v40 }
  0xbe   : > { %1724 = vmatmul.mubr.msk.f32.gmra.mxu1 %vm375_vm1, %v1781_v39  ;;  %v2234_v39 = vpop.permute.xlu0 %829 }
  0xbf   : > { %v1785_v41 = vpop.eup %1784  ;;  %2800 = vst [vmem:[#allocation7_spill] sm:$0xff] %v2234_v39 }
  0xc0   : > { %v1787_v42 = vpop.eup %1786 }
  0xc1   : > { %1726 = vmatprep.mubr.msk.f32.mxu1 %vm375_vm1, %v1787_v42  ;;  %v2237_v42 = vpop.permute.xlu1 %794 }
  0xc2   : > { %1727 = vmatmul.mubr.msk.f32.gmra.mxu1 %vm375_vm1, %v1785_v41 }
 0x168   : > { %v1707_v44 = vpop.f32.mrf.mxu0 }
 0x169   : > { %v2140_v45 = vadd.f32 %v1707_v44, %v2137_v43  ;;  %v2239_v44 = vpop.permute.xlu0 %834 }
 0x16a   : > { %v490_v49 = vpop.f32.mrf.mxu0  ;;  %2801 = vst [vmem:[#allocation8_spill] sm:$0xff] %v2239_v44 }
 0x16b   : > { %1067 = vrot.lane.b32.xlu0 %v2140_v45, %s1986_s9  ;;  %v572_v46 = vsel %vm375_vm1, %v2140_v45, -inf  ;;  %v2147_v51 = vadd.f32 %v2137_v43, %v490_v49 }
 0x16c   : > { %573 = vmax.xlane.f32.xlu1 %v572_v46  ;;  %v1710_v61 = vpop.f32.mrf.mxu0 }
 0x16d   : > { %v569_v59 = vsel %vm375_vm1, %v2147_v51, -inf  ;;  %v2169_v63 = vadd.f32 %v1710_v61, %v2137_v43  ;;  %v873_v22 = vsub.f32 0.0, %v2147_v51 }
 0x16e   : > { %v500_v0 = vpop.f32.mrf.mxu0 }
 0x16f   : > { %v2174_v1 = vadd.f32 %v2137_v43, %v500_v0  ;;  %v578_v3 = vsel %vm375_vm1, %v2169_v63, -inf  ;;  %v889_v25 = vmul.f32 1.442695, %v873_v22 }
 0x170   : > { %v1713_v6 = vpop.f32.mrf.mxu0 }
 0x171   : > { %v575_v5 = vsel %vm375_vm1, %v2174_v1, -inf  ;;  %v2206_v18 = vadd.f32 %v1713_v6, %v2137_v43 }
 0x172   : > { %v510_v8 = vpop.f32.mrf.mxu0 }
 0x173   : > { %v2193_v11 = vadd.f32 %v2137_v43, %v510_v8 }
 0x174   : > { %v1716_v10 = vpop.f32.mrf.mxu0 }
 0x175   : > { %v581_v13 = vsel %vm375_vm1, %v2193_v11, -inf  ;;  %v2224_v30 = vadd.f32 %v1716_v10, %v2137_v43 }
 0x176   : > { %v1719_v47 = vpop.f32.mrf.mxu1  ;;  %v520_v14 = vpop.f32.mrf.mxu0 }
 0x177   : > { %v2157_v57 = vadd.f32 %v1719_v47, %v2137_v43  ;;  %v2201_v15 = vadd.f32 %v2137_v43, %v520_v14  ;;  %v880_v31 = vsub.f32 0.0, %v2224_v30  ;;  %v584_v47 = vsel %vm375_vm1, %v2206_v18, -inf }
 0x178   : > { %v530_v48 = vpop.f32.mrf.mxu1 }
 0x179   : > { %2799 = vst [vmem:[#allocation6_spill] sm:$0xff] %v2157_v57  ;;  %v596_v58 = vsel %vm375_vm1, %v2157_v57, -inf  ;;  %v2164_v60 = vadd.f32 %v2137_v43, %v530_v48  ;;  %v882_v19 = vsub.f32 0.0, %v2157_v57  ;;  %v587_v21 = vsel %vm375_vm1, %v2201_v15, -inf }
 0x17a   : > { %v1722_v50 = vpop.f32.mrf.mxu1  ;;  %v903_v35 = vmul.f32 1.442695, %v880_v31  ;;  %v878_v31 = vsub.f32 0.0, %v2206_v18 }
 0x17b   : > { %v593_v62 = vsel %vm375_vm1, %v2164_v60, -inf  ;;  %v2179_v2 = vadd.f32 %v1722_v50, %v2137_v43  ;;  %v907_v23 = vmul.f32 1.442695, %v882_v19  ;;  %v881_v26 = vsub.f32 0.0, %v2164_v60  ;;  %v2251_v50 = vpop.permute.xlu1 %804 }
 0x17c   : > { %v540_v52 = vpop.f32.mrf.mxu1 }
 0x17d   : > { %1065 = vrot.lane.b32.xlu1 %v2147_v51, %s1986_s9  ;;  %v602_v4 = vsel %vm375_vm1, %v2179_v2, -inf  ;;  %v2188_v7 = vadd.f32 %v2137_v43, %v540_v52  ;;  %1788 = vpow2.f32 %v907_v23  ;;  %v905_v28 = vmul.f32 1.442695, %v881_v26  ;;  %v2253_v52 = vpop.permute.xlu0 %839 }
 0x17e   : > { %v2149_v53 = vpop.f32.mrf.mxu1  ;;  %1790 = vpow2.f32 %v889_v25  ;;  %2802 = vst [vmem:[#allocation9_spill] sm:$0xff] %v2253_v52  ;;  %v875_v26 = vsub.f32 0.0, %v2174_v1 }
 0x17f   : > { %v599_v9 = vsel %vm375_vm1, %v2188_v7, -inf  ;;  %v883_v29 = vsub.f32 0.0, %v2188_v7  ;;  %1792 = vpow2.f32 %v905_v28  ;;  %v2243_v46 = vadd.f32 %v2149_v53, %v2137_v43 }
 0x180   : > { %v550_v54 = vpop.f32.mrf.mxu1 }
 0x181   : > { %v2196_v12 = vadd.f32 %v2137_v43, %v550_v54  ;;  %v909_v32 = vmul.f32 1.442695, %v883_v29  ;;  %v608_v49 = vsel %vm375_vm1, %v2243_v46, -inf  ;;  %v2258_v53 = vpop.permute.xlu0 %844  ;;  %v893_v29 = vmul.f32 1.442695, %v875_v26 }
 0x182   : > { %v1728_v55 = vpop.f32.mrf.mxu1  ;;  %2803 = vst [vmem:[#allocation10_spill] sm:$0xff] %v2258_v53 }
 0x183   : > { %v2154_v56 = vadd.f32 %v1728_v55, %v2137_v43  ;;  %v605_v16 = vsel %vm375_vm1, %v2196_v12, -inf  ;;  %1794 = vpow2.f32 %v909_v32 }
 0x184   : > { %v560_v17 = vpop.f32.mrf.mxu1  ;;  %1796 = vpow2.f32 %v903_v35  ;;  %v899_v35 = vmul.f32 1.442695, %v878_v31 }
 0x185   : > { %v2210_v20 = vadd.f32 %v2137_v43, %v560_v17  ;;  %v2256_v43 = vpop.permute.xlu1 %809  ;;  %v614_v19 = vsel %vm375_vm1, %v2154_v56, -inf }
 0x187   : > { %v611_v24 = vsel %vm375_vm1, %v2210_v20, -inf }
 0x18a   : > { %597 = vmax.xlane.f32.xlu0 %v596_v58  ;;  %v1789_v37 = vpop.eup %1788  ;;  %v2262_v58 = vpop.permute.xlu1 %814 }
 0x18b   : > { %v1791_v40 = vpop.eup %1790  ;;  %2805 = vst [vmem:[#allocation12_spill] sm:$0xff] %v2262_v58 }
 0x18c   : > { %v1793_v41 = vpop.eup %1792 }
 0x18e   : > { %570 = vmax.xlane.f32.xlu0 %v569_v59  ;;  %v2266_v61 = vpop.permute.xlu1 %819 }
 0x18f   : > { %2806 = vst [vmem:[#allocation13_spill] sm:$0xff] %v2266_v61 }
 0x190   : > { %v1795_v48 = vpop.eup %1794 }
 0x191   : > { %v1797_v54 = vpop.eup %1796 }
 0x1a1   : > { %594 = vmax.xlane.f32.xlu1 %v593_v62 }
 0x1a4   : > { %1071 = vrot.lane.b32.xlu0 %v2169_v63, %s1986_s9 }
 0x1b2   : > { %1069 = vrot.lane.b32.xlu1 %v2174_v1, %s1986_s9 }
 0x1c3   : > { %579 = vmax.xlane.f32.xlu0 %v578_v3 }
 0x1c7   : > { %603 = vmax.xlane.f32.xlu0 %v602_v4  ;;  %v2274_v4 = vpop.permute.xlu1 %824 }
 0x1c8   : > { %2807 = vst [vmem:[#allocation14_spill] sm:$0xff] %v2274_v4  ;;  %v886_v4 = vsub.f32 0.0, %v2243_v46 }
 0x1cb   : > { %576 = vmax.xlane.f32.xlu0 %v575_v5 }
 0x1d6   : > { %600 = vmax.xlane.f32.xlu1 %v599_v9 }
 0x1da   : > { %582 = vmax.xlane.f32.xlu1 %v581_v13 }
 0x1dd   : > { %v2260_v55 = vpop.permute.xlu0 %1067 }
 0x1de   : > { %606 = vmax.xlane.f32.xlu1 %v605_v16  ;;  %2804 = vst [vmem:[#allocation11_spill] sm:$0xff] %v2260_v55  ;;  %v590_v16 = vsel %vm375_vm1, %v2224_v30, -inf }
 0x1e1   : > { %1075 = vrot.lane.b32.xlu0 %v2206_v18, %s1986_s9 }
 0x1e2   : > { %588 = vmax.xlane.f32.xlu1 %v587_v21  ;;  %v874_v21 = vsub.f32 0.0, %v2140_v45 }
 0x1e4   : > { %v891_v23 = vmul.f32 1.442695, %v874_v21 }
 0x1e6   : > { %612 = vmax.xlane.f32.xlu1 %v611_v24  ;;  %v876_v24 = vsub.f32 0.0, %v2169_v63 }
 0x1e8   : > { %v895_v25 = vmul.f32 1.442695, %v876_v24 }
 0x1f5   : > { %v2276_v5 = vpop.xlane.xlu1 %573 }
 0x1f7   : > { %955 = vrot.lane.b32.xlu1 %v1789_v37, %s1986_s9  ;;  %v877_v37 = vsub.f32 0.0, %v2193_v11 }
 0x1f9   : > { %v2278_v6 = vpop.permute.xlu1 %1065 }
 0x1fb   : > { %937 = vrot.lane.b32.xlu1 %v1791_v40, %s1986_s9  ;;  %v879_v40 = vsub.f32 0.0, %v2201_v15 }
 0x1ff   : > { %953 = vrot.lane.b32.xlu1 %v1793_v41, %s1986_s9 }
 0x200   : > { %585 = vmax.xlane.f32.xlu0 %v584_v47  ;;  %v897_v47 = vmul.f32 1.442695, %v877_v37 }
 0x203   : > { %957 = vrot.lane.b32.xlu1 %v1795_v48, %s1986_s9 }
 0x204   : > { %609 = vmax.xlane.f32.xlu0 %v608_v49  ;;  %v901_v49 = vmul.f32 1.442695, %v879_v40  ;;  %v2325_v40 = vsub.f32 %v2140_v45, %v2276_v5  ;;  %v884_v5 = vsub.f32 0.0, %v2179_v2 }
 0x207   : > { %951 = vrot.lane.b32.xlu1 %v1797_v54, %s1986_s9 }
 0x213   : > { %v2264_v59 = vpop.xlane.xlu0 %597 }
 0x217   : > { %v571_v62 = vpop.xlane.xlu0 %570 }
 0x218   : > { %v2269_v0 = vsub.f32 %v2147_v51, %v571_v62 }
 0x21a   : > { %v633_v3 = vmul.f32 1.442695, %v2269_v0  ;;  %1073 = vrot.lane.b32.xlu0 %v2193_v11, %s1986_s9 }
 0x21b   : > { %v2293_v28 = vpop.permute.xlu0 %1071 }
 0x21c   : > { %1798 = vpow2.f32 %v633_v3 }
 0x229   : > { %v1799_v8 = vpop.eup %1798 }
 0x22a   : > { %v595_v9 = vpop.xlane.xlu1 %594  ;;  %v665_v10 = vsel %vm375_vm1, %v1799_v8, 0.0 }
 0x22b   : > { %v2282_v13 = vsub.f32 %v2164_v60, %v595_v9  ;;  %666 = vadd.xlane.f32.xlu1 %v665_v10 }
 0x22d   : > { %v649_v14 = vmul.f32 1.442695, %v2282_v13 }
 0x22e   : > { %v2304_v10 = vpop.permute.xlu1 %1069 }
 0x22f   : > { %1800 = vpow2.f32 %v649_v14 }
 0x230   : > { %1802 = vpow2.f32 %v891_v23 }
 0x231   : > { %1804 = vpow2.f32 %v895_v25 }
 0x232   : > { %1806 = vpow2.f32 %v893_v29 }
 0x233   : > { %1808 = vpow2.f32 %v899_v35 }
 0x234   : > { %1810 = vpow2.f32 %v897_v47 }
 0x235   : > { %1812 = vpow2.f32 %v901_v49  ;;  %v2330_v49 = vsub.f32 %v2157_v57, %v2264_v59 }
 0x239   : > { %591 = vmax.xlane.f32.xlu0 %v590_v16 }
 0x23c   : > { %v1801_v17 = vpop.eup %1800 }
 0x23d   : > { %615 = vmax.xlane.f32.xlu0 %v614_v19  ;;  %v689_v22 = vsel %vm375_vm1, %v1801_v17, 0.0  ;;  %v1803_v48 = vpop.eup %1802 }
 0x23e   : > { %690 = vadd.xlane.f32.xlu1 %v689_v22  ;;  %v1805_v3 = vpop.eup %1804 }
 0x23f   : > { %v1807_v9 = vpop.eup %1806 }
 0x240   : > { %v1809_v14 = vpop.eup %1808 }
 0x241   : > { %v1811_v19 = vpop.eup %1810 }
 0x242   : > { %v1813_v24 = vpop.eup %1812 }
 0x24c   : > { %v580_v32 = vpop.xlane.xlu0 %579 }
 0x250   : > { %v604_v41 = vpop.xlane.xlu0 %603 }
 0x253   : > { %939 = vrot.lane.b32.xlu0 %v1803_v48, %s1986_s9  ;;  %v635_v48 = vmul.f32 1.442695, %v2325_v40 }
 0x254   : > { %v577_v54 = vpop.xlane.xlu0 %576 }
 0x255   : > { %v2300_v62 = vsub.f32 %v2174_v1, %v577_v54 }
 0x257   : > { %v637_v8 = vmul.f32 1.442695, %v2300_v62  ;;  %943 = vrot.lane.b32.xlu0 %v1805_v3, %s1986_s9 }
 0x259   : > { %1814 = vpow2.f32 %v637_v8  ;;  %v651_v8 = vmul.f32 1.442695, %v2330_v49 }
 0x25b   : > { %941 = vrot.lane.b32.xlu0 %v1807_v9, %s1986_s9  ;;  %v2335_v9 = vsub.f32 %v2169_v63, %v580_v32 }
 0x25d   : > { %v639_v59 = vmul.f32 1.442695, %v2335_v9 }
 0x25f   : > { %v601_v16 = vpop.xlane.xlu1 %600  ;;  %947 = vrot.lane.b32.xlu0 %v1809_v14, %s1986_s9 }
 0x260   : > { %v2309_v17 = vsub.f32 %v2188_v7, %v601_v16 }
 0x262   : > { %v653_v21 = vmul.f32 1.442695, %v2309_v17 }
 0x263   : > { %v583_v22 = vpop.xlane.xlu1 %582  ;;  %945 = vrot.lane.b32.xlu0 %v1811_v19, %s1986_s9  ;;  %v2341_v19 = vsub.f32 %v2179_v2, %v604_v41 }
 0x264   : > { %1816 = vpow2.f32 %v653_v21  ;;  %v2314_v23 = vsub.f32 %v2193_v11, %v583_v22  ;;  %v911_v21 = vmul.f32 1.442695, %v884_v5  ;;  %v885_v22 = vsub.f32 0.0, %v2196_v12 }
 0x265   : > { %v655_v32 = vmul.f32 1.442695, %v2341_v19 }
 0x266   : > { %v1815_v25 = vpop.eup %1814  ;;  %v641_v26 = vmul.f32 1.442695, %v2314_v23 }
 0x267   : > { %v607_v29 = vpop.xlane.xlu1 %606  ;;  %949 = vrot.lane.b32.xlu0 %v1813_v24, %s1986_s9  ;;  %v671_v31 = vsel %vm375_vm1, %v1815_v25, 0.0  ;;  %v913_v25 = vmul.f32 1.442695, %v885_v22 }
 0x268   : > { %1818 = vpow2.f32 %v641_v26  ;;  %v2320_v35 = vsub.f32 %v2196_v12, %v607_v29  ;;  %672 = vadd.xlane.f32.xlu1 %v671_v31  ;;  %v2346_v29 = vpop.permute.xlu0 %1075 }
 0x26a   : > { %v657_v37 = vmul.f32 1.442695, %v2320_v35 }
 0x26c   : > { %1820 = vpow2.f32 %v657_v37 }
 0x26d   : > { %1822 = vpow2.f32 %v635_v48 }
 0x26e   : > { %1824 = vpow2.f32 %v651_v8 }
 0x26f   : > { %1826 = vpow2.f32 %v639_v59 }
 0x270   : > { %1828 = vpow2.f32 %v911_v21 }
 0x271   : > { %v1817_v47 = vpop.eup %1816  ;;  %1830 = vpow2.f32 %v655_v32  ;;  %v589_v32 = vpop.xlane.xlu1 %588 }
 0x272   : > { %v695_v54 = vsel %vm375_vm1, %v1817_v47, 0.0  ;;  %1832 = vpow2.f32 %v913_v25 }
 0x273   : > { %696 = vadd.xlane.f32.xlu1 %v695_v54 }
 0x275   : > { %v1819_v3 = vpop.eup %1818 }
 0x276   : > { %v677_v14 = vsel %vm375_vm1, %v1819_v3, 0.0 }
 0x277   : > { %678 = vadd.xlane.f32.xlu1 %v677_v14 }
 0x279   : > { %v1821_v16 = vpop.eup %1820 }
 0x27a   : > { %v701_v24 = vsel %vm375_vm1, %v1821_v16, 0.0  ;;  %v1823_v26 = vpop.eup %1822 }
 0x27b   : > { %702 = vadd.xlane.f32.xlu1 %v701_v24  ;;  %v668_v31 = vsel %vm375_vm1, %v1823_v26, 0.0  ;;  %v1825_v41 = vpop.eup %1824  ;;  %v2363_v26 = vsub.f32 %v2201_v15, %v589_v32 }
 0x27c   : > { %v692_v47 = vsel %vm375_vm1, %v1825_v41, 0.0  ;;  %v1827_v48 = vpop.eup %1826 }
 0x27d   : > { %v1829_v3 = vpop.eup %1828  ;;  %v674_v14 = vsel %vm375_vm1, %v1827_v48, 0.0 }
 0x27e   : > { %v1831_v16 = vpop.eup %1830 }
 0x27f   : > { %v1833_v21 = vpop.eup %1832  ;;  %v698_v24 = vsel %vm375_vm1, %v1831_v16, 0.0 }
 0x286   : > { %669 = vadd.xlane.f32.xlu0 %v668_v31 }
 0x289   : > { %v586_v37 = vpop.xlane.xlu0 %585 }
 0x28a   : > { %v2351_v54 = vsub.f32 %v2206_v18, %v586_v37  ;;  %693 = vadd.xlane.f32.xlu0 %v692_v47  ;;  %v645_v37 = vmul.f32 1.442695, %v2363_v26 }
 0x28c   : > { %v643_v8 = vmul.f32 1.442695, %v2351_v54  ;;  %959 = vrot.lane.b32.xlu1 %v1829_v3, %s1986_s9 }
 0x28d   : > { %v610_v5 = vpop.xlane.xlu0 %609 }
 0x28e   : > { %1834 = vpow2.f32 %v643_v8  ;;  %v2357_v59 = vsub.f32 %v2243_v46, %v610_v5  ;;  %675 = vadd.xlane.f32.xlu0 %v674_v14 }
 0x290   : > { %v659_v22 = vmul.f32 1.442695, %v2357_v59  ;;  %961 = vrot.lane.b32.xlu1 %v1833_v21, %s1986_s9  ;;  %v613_v21 = vpop.xlane.xlu1 %612 }
 0x291   : > { %v2369_v8 = vpop.permute.xlu0 %1073 }
 0x292   : > { %1836 = vpow2.f32 %v659_v22  ;;  %699 = vadd.xlane.f32.xlu0 %v698_v24  ;;  %2808 = vst [vmem:[#allocation15_spill] sm:$0xff] %v2369_v8  ;;  %v2378_v22 = vsub.f32 %v2210_v20, %v613_v21 }
 0x293   : > { %1838 = vpow2.f32 %v645_v37 }
 0x294   : > { %v661_v32 = vmul.f32 1.442695, %v2378_v22  ;;  %v2393_v21 = vpop.permute.xlu1 %955 }
 0x295   : > { %2809 = vst [vmem:[#allocation16_spill] sm:$0xff] %v2393_v21 }
 0x29b   : > { %v1835_v25 = vpop.eup %1834 }
 0x29c   : > { %v680_v31 = vsel %vm375_vm1, %v1835_v25, 0.0 }
 0x29d   : > { %681 = vadd.xlane.f32.xlu0 %v680_v31  ;;  %v887_v31 = vsub.f32 0.0, %v2210_v20 }
 0x29f   : > { %v1837_v41 = vpop.eup %1836 }
 0x2a0   : > { %v704_v47 = vsel %vm375_vm1, %v1837_v41, 0.0  ;;  %v1839_v48 = vpop.eup %1838 }
 0x2a1   : > { %705 = vadd.xlane.f32.xlu0 %v704_v47  ;;  %v683_v3 = vsel %vm375_vm1, %v1839_v48, 0.0  ;;  %v917_v47 = vmul.f32 1.442695, %v887_v31  ;;  %v2399_v31 = vpop.permute.xlu1 %937 }
 0x2b4   : > { %684 = vadd.xlane.f32.xlu1 %v683_v3 }
 0x2c2   : > { %v592_v5 = vpop.xlane.xlu0 %591 }
 0x2c3   : > { %v2372_v14 = vsub.f32 %v2224_v30, %v592_v5 }
 0x2c5   : > { %v647_v16 = vmul.f32 1.442695, %v2372_v14  ;;  %1083 = vrot.lane.b32.xlu1 %v2157_v57, %s1986_s9  ;;  %v915_v57 = vmul.f32 1.442695, %v886_v4 }
 0x2c6   : > { %v616_v37 = vpop.xlane.xlu0 %615 }
 0x2c7   : > { %1840 = vpow2.f32 %v647_v16  ;;  %v2389_v5 = vsub.f32 %v2154_v56, %v616_v37 }
 0x2c8   : > { %1842 = vpow2.f32 %v661_v32 }
 0x2c9   : > { %1844 = vpow2.f32 %v917_v47  ;;  %v2403_v47 = vpop.permute.xlu1 %953 }
 0x2ca   : > { %v2386_v3 = vpop.permute.xlu0 %939  ;;  %2810 = vst [vmem:[#allocation17_spill] sm:$0xff] %v2403_v47 }
 0x2cd   : > { %v2407_v36 = vpop.permute.xlu1 %957 }
 0x2ce   : > { %v2391_v16 = vpop.permute.xlu0 %943  ;;  %2811 = vst [vmem:[#allocation18_spill] sm:$0xff] %v2407_v36 }
 0x2d1   : > { %v2412_v39 = vpop.permute.xlu1 %951 }
 0x2d2   : > { %2812 = vst [vmem:[#allocation19_spill] sm:$0xff] %v2412_v39 }
 0x2d4   : > { %v1841_v24 = vpop.eup %1840 }
 0x2d5   : > { %v686_v25 = vsel %vm375_vm1, %v1841_v24, 0.0  ;;  %v1843_v41 = vpop.eup %1842  ;;  %v663_v24 = vmul.f32 1.442695, %v2389_v5 }
 0x2d6   : > { %687 = vadd.xlane.f32.xlu0 %v686_v25  ;;  %v707_v48 = vsel %vm375_vm1, %v1843_v41, 0.0  ;;  %v1845_v32 = vpop.eup %1844  ;;  %v2396_v25 = vpop.permute.xlu0 %941 }
 0x2d7   : > { %1846 = vpow2.f32 %v663_v24 }
 0x2da   : > { %v2401_v41 = vpop.permute.xlu0 %947 }
 0x2de   : > { %v2405_v37 = vpop.permute.xlu0 %945 }
 0x2e2   : > { %v2410_v52 = vpop.permute.xlu0 %949 }
 0x2e9   : > { %708 = vadd.xlane.f32.xlu1 %v707_v48  ;;  %v1847_v48 = vpop.eup %1846 }
 0x2ea   : > { %v710_v53 = vsel %vm375_vm1, %v1847_v48, 0.0 }
 0x2ec   : > { %1077 = vrot.lane.b32.xlu0 %v2201_v15, %s1986_s9 }
 0x2fa   : > { %965 = vrot.lane.b32.xlu1 %v1845_v32, %s1986_s9  ;;  %v667_v32 = vpop.xlane.xlu1 %666 }
 0x2fe   : > { %v691_v61 = vpop.xlane.xlu1 %690 }
 0x302   : > { %v673_v21 = vpop.xlane.xlu1 %672 }
 0x306   : > { %v697_v48 = vpop.xlane.xlu1 %696 }
 0x30b   : > { %711 = vadd.xlane.f32.xlu0 %v710_v53  ;;  %v775_v53 = vld [vmem:[%s2033_s24 + $0x70] sm:$0xff] }
 0x30f   : > { %v670_v24 = vpop.xlane.xlu0 %669 }
 0x310   : > { %1848 = vlog2.f32 %v670_v24 }
 0x313   : > { %v694_v44 = vpop.xlane.xlu0 %693 }
 0x314   : > { %1850 = vlog2.f32 %v694_v44 }
 0x317   : > { %v676_v47 = vpop.xlane.xlu0 %675 }
 0x318   : > { %1852 = vlog2.f32 %v676_v47  ;;  %v679_v47 = vpop.xlane.xlu1 %678 }
 0x319   : > { %1854 = vlog2.f32 %v673_v21 }
 0x31a   : > { %1856 = vpow2.f32 %v915_v57  ;;  %v776_v57 = vld [vmem:[%s2033_s24 + $0x78] sm:$0xff] }
 0x31b   : > { %v700_v44 = vpop.xlane.xlu0 %699  ;;  %1858 = vlog2.f32 %v667_v32 }
 0x31c   : > { %1860 = vlog2.f32 %v679_v47 }
 0x31d   : > { %v1849_v36 = vpop.eup %1848 }
 0x31e   : > { %v716_v58 = vmul.f32 0.6931472, %v1849_v36  ;;  %v888_v36 = vsub.f32 0.0, %v2154_v56 }
 0x320   : > { %v746_v39 = vsub.f32 %v2325_v40, %v716_v58 }
 0x321   : > { %v1851_v8 = vpop.eup %1850  ;;  %849 = vperm.xlu0 %1754, %v775_v53  }
 0x322   : > { %v732_v24 = vmul.f32 0.6931472, %v1851_v8  ;;  %1147 = vrot.lane.b32.xlu1 %v746_v39, %s1987_s10  ;;  %v919_v39 = vmul.f32 1.442695, %v888_v36 }
 0x324   : > { %v754_v21 = vsub.f32 %v2330_v49, %v732_v24 }
 0x325   : > { %v1853_v55 = vpop.eup %1852  ;;  %1079 = vrot.lane.b32.xlu0 %v2224_v30, %s1986_s9 }
 0x326   : > { %1163 = vrot.lane.b32.xlu1 %v754_v21, %s1987_s10  ;;  %v682_v58 = vpop.xlane.xlu0 %681  ;;  %v720_v4 = vmul.f32 0.6931472, %v1853_v55  ;;  %v1855_v40 = vpop.eup %1854 }
 0x327   : > { %1862 = vlog2.f32 %v682_v58  ;;  %v718_v49 = vmul.f32 0.6931472, %v1855_v40  ;;  %v1857_v32 = vpop.eup %1856 }
 0x328   : > { %1864 = vlog2.f32 %v691_v61  ;;  %v748_v8 = vsub.f32 %v2335_v9, %v720_v4  ;;  %v1859_v53 = vpop.eup %1858  ;;  %v703_v9 = vpop.xlane.xlu1 %702 }
 0x329   : > { %854 = vperm.xlu0 %1754, %v776_v57   ;;  %1866 = vpow2.f32 %v919_v39  ;;  %v747_v55 = vsub.f32 %v2300_v62, %v718_v49  ;;  %v1861_v24 = vpop.eup %1860  ;;  %v714_v61 = vmul.f32 0.6931472, %v1859_v53 }
 0x32a   : > { %1087 = vrot.lane.b32.xlu1 %v2179_v2, %s1986_s9  ;;  %1868 = vlog2.f32 %v697_v48  ;;  %v722_v36 = vmul.f32 0.6931472, %v1861_v24  ;;  %v706_v57 = vpop.xlane.xlu0 %705 }
 0x32b   : > { %1870 = vlog2.f32 %v700_v44  ;;  %v745_v48 = vsub.f32 %v2269_v0, %v714_v61 }
 0x32c   : > { %1872 = vlog2.f32 %v703_v9  ;;  %v749_v40 = vsub.f32 %v2314_v23, %v722_v36  ;;  %v863_v9 = vsub.f32 %v2256_v43, %v2201_v15 }
 0x32d   : > { %1081 = vrot.lane.b32.xlu0 %v2164_v60, %s1986_s9  ;;  %1874 = vlog2.f32 %v706_v57 }
 0x32e   : > { %1151 = vrot.lane.b32.xlu1 %v748_v8, %s1987_s10 }
 0x331   : > { %963 = vrot.lane.b32.xlu0 %v1857_v32, %s1986_s9 }
 0x332   : > { %1149 = vrot.lane.b32.xlu1 %v747_v55, %s1987_s10 }
 0x334   : > { %v1863_v47 = vpop.eup %1862 }
 0x335   : > { %v724_v21 = vmul.f32 0.6931472, %v1863_v47  ;;  %1085 = vrot.lane.b32.xlu0 %v2188_v7, %s1986_s9  ;;  %v1865_v62 = vpop.eup %1864 }
 0x336   : > { %v1867_v4 = vpop.eup %1866  ;;  %v730_v44 = vmul.f32 0.6931472, %v1865_v62 }
 0x337   : > { %v750_v58 = vsub.f32 %v2351_v54, %v724_v21  ;;  %v1869_v39 = vpop.eup %1868  ;;  %v991_v21 = vmul.f32 %v2410_v52, %v863_v9  ;;  %v859_v9 = vsub.f32 %v2232_v38, %v2174_v1 }
 0x338   : > { %v753_v0 = vsub.f32 %v2282_v13, %v730_v44  ;;  %v734_v49 = vmul.f32 0.6931472, %v1869_v39  ;;  %v1871_v54 = vpop.eup %1870 }
 0x339   : > { %1145 = vrot.lane.b32.xlu0 %v745_v48, %s1987_s10  ;;  %1155 = vrot.lane.b32.xlu1 %v750_v58, %s1987_s10  ;;  %v736_v32 = vmul.f32 0.6931472, %v1871_v54  ;;  %v1873_v53 = vpop.eup %1872  ;;  %v1007_v36 = vmul.f32 -0.5, %v991_v21 }
 0x33a   : > { %v755_v8 = vsub.f32 %v2309_v17, %v734_v49  ;;  %v738_v55 = vmul.f32 0.6931472, %v1873_v53  ;;  %v1875_v24 = vpop.eup %1874  ;;  %v2452_v17 = vpop.permute.xlu1 %959 }
 0x33b   : > { %v756_v23 = vsub.f32 %v2341_v19, %v736_v32  ;;  %v740_v47 = vmul.f32 0.6931472, %v1875_v24  ;;  %v1023_v58 = vmul.f32 %v1007_v36, %v991_v21 }
 0x33c   : > { %v757_v61 = vsub.f32 %v2320_v35, %v738_v55 }
 0x33d   : > { %967 = vrot.lane.b32.xlu0 %v1867_v4, %s1986_s9  ;;  %1153 = vrot.lane.b32.xlu1 %v749_v40, %s1987_s10  ;;  %v758_v13 = vsub.f32 %v2357_v59, %v740_v47  ;;  %v2459_v62 = vadd.f32 -0.9189385, %v1023_v58 }
 0x33e   : > { %v2457_v19 = vpop.permute.xlu1 %961 }
 0x341   : > { %1161 = vrot.lane.b32.xlu0 %v753_v0, %s1987_s10 }
 0x342   : > { %v685_v48 = vpop.xlane.xlu1 %684 }
 0x343   : > { %1876 = vlog2.f32 %v685_v48 }
 0x345   : > { %1165 = vrot.lane.b32.xlu0 %v755_v8, %s1987_s10 }
 0x346   : > { %v2465_v15 = vpop.permute.xlu1 %1083 }
 0x349   : > { %1167 = vrot.lane.b32.xlu0 %v756_v23, %s1987_s10 }
 0x34d   : > { %1169 = vrot.lane.b32.xlu0 %v757_v61, %s1987_s10 }
 0x350   : > { %v1877_v4 = vpop.eup %1876 }
 0x351   : > { %1171 = vrot.lane.b32.xlu0 %v758_v13, %s1987_s10  ;;  %v726_v43 = vmul.f32 0.6931472, %v1877_v4  ;;  %v862_v4 = vsub.f32 %v2251_v50, %v2206_v18 }
 0x353   : > { %v751_v0 = vsub.f32 %v2363_v26, %v726_v43 }
 0x35f   : > { %v688_v35 = vpop.xlane.xlu0 %687 }
 0x360   : > { %1878 = vlog2.f32 %v688_v35  ;;  %v860_v35 = vsub.f32 %v2237_v42, %v2169_v63 }
 0x363   : > { %v2461_v59 = vpop.permute.xlu0 %1077 }
 0x364   : > { %v1119_v57 = vsub.f32 %v2459_v62, %v2461_v59 }
 0x36d   : > { %v1879_v44 = vpop.eup %1878 }
 0x36e   : > { %v728_v52 = vmul.f32 0.6931472, %v1879_v44 }
 0x370   : > { %v752_v40 = vsub.f32 %v2372_v14, %v728_v52  ;;  %v990_v52 = vmul.f32 %v2401_v41, %v862_v4 }
 0x372   : > { %v709_v39 = vpop.xlane.xlu1 %708  ;;  %1159 = vrot.lane.b32.xlu1 %v752_v40, %s1987_s10 }
 0x373   : > { %1880 = vlog2.f32 %v709_v39 }
 0x376   : > { %1157 = vrot.lane.b32.xlu1 %v751_v0, %s1987_s10  ;;  %v966_v8 = vpop.permute.xlu1 %965  ;;  %v1006_v0 = vmul.f32 -0.5, %v990_v52 }
 0x37a   : > { %1089 = vrot.lane.b32.xlu1 %v2196_v12, %s1986_s9 }
 0x37e   : > { %1091 = vrot.lane.b32.xlu1 %v2243_v46, %s1986_s9 }
 0x380   : > { %v1881_v49 = vpop.eup %1880 }
 0x381   : > { %v742_v54 = vmul.f32 0.6931472, %v1881_v49 }
 0x382   : > { %1093 = vrot.lane.b32.xlu1 %v2210_v20, %s1986_s9 }
 0x383   : > { %v759_v14 = vsub.f32 %v2378_v22, %v742_v54  ;;  %v857_v22 = vsub.f32 %v2227_v33, %v2147_v51 }
 0x385   : > { %1173 = vrot.lane.b32.xlu0 %v759_v14, %s1987_s10  ;;  %v985_v13 = vmul.f32 %v2399_v31, %v857_v22  ;;  %v988_v31 = vmul.f32 %v2391_v16, %v860_v35  ;;  %v858_v16 = vsub.f32 %v2220_v27, %v2140_v45  ;;  %v2813_v35 = vld [vmem:[#allocation11_spill] sm:$0xff] }
 0x386   : > { %1095 = vrot.lane.b32.xlu1 %v2154_v56, %s1986_s9 }
 0x387   : > { %v1001_v58 = vmul.f32 -0.5, %v985_v13  ;;  %v986_v18 = vmul.f32 %v2386_v3, %v858_v16  ;;  %v2818_v16 = vld [vmem:[#allocation19_spill] sm:$0xff] }
 0x389   : > { %v1017_v38 = vmul.f32 %v1001_v58, %v985_v13  ;;  %v1002_v27 = vmul.f32 -0.5, %v986_v18 }
 0x38b   : > { %v1659_v42 = vadd.f32 -0.9189385, %v1017_v38  ;;  %v1018_v13 = vmul.f32 %v1002_v27, %v986_v18  ;;  %v2819_v18 = vld [vmem:[#allocation16_spill] sm:$0xff] }
 0x38d   : > { %v1113_v49 = vsub.f32 %v1659_v42, %v2278_v6 }
 0x394   : > { %v712_v26 = vpop.xlane.xlu0 %711  ;;  %v2481_v32 = vpop.permute.xlu1 %1147 }
 0x395   : > { %1882 = vlog2.f32 %v712_v26  ;;  %v1022_v26 = vmul.f32 %v1006_v0, %v990_v52 }
 0x397   : > { %v1664_v3 = vadd.f32 -0.9189385, %v1022_v26 }
 0x398   : > { %v2490_v47 = vpop.permute.xlu1 %1163 }
 0x39c   : > { %v850_v53 = vpop.permute.xlu0 %849  ;;  %v2502_v51 = vpop.permute.xlu1 %1087 }
 0x39d   : > { %v871_v55 = vsub.f32 %v850_v53, %v2210_v20  ;;  %v987_v20 = vmul.f32 %v2396_v25, %v859_v9  ;;  %v861_v53 = vsub.f32 %v2229_v34, %v2193_v11  ;;  %v1118_v9 = vsub.f32 %v1664_v3, %v2346_v29  ;;  %v2814_v29 = vld [vmem:[#allocation15_spill] sm:$0xff] }
 0x39f   : > { %v2484_v23 = vmul.f32 %v966_v8, %v871_v55  ;;  %v1003_v1 = vmul.f32 -0.5, %v987_v20  ;;  %v989_v6 = vmul.f32 %v2405_v37, %v861_v53 }
 0x3a0   : > { %v2486_v24 = vpop.permute.xlu0 %1079  ;;  %v1152_v63 = vpop.permute.xlu1 %1151 }
 0x3a1   : > { %v1019_v44 = vmul.f32 %v1003_v1, %v987_v20  ;;  %v1005_v11 = vmul.f32 -0.5, %v989_v6  ;;  %v1660_v20 = vadd.f32 -0.9189385, %v1018_v13 }
 0x3a2   : > { %v1883_v61 = vpop.eup %1882 }
 0x3a3   : > { %v744_v21 = vmul.f32 0.6931472, %v1883_v61  ;;  %v1661_v39 = vadd.f32 -0.9189385, %v1019_v44 }
 0x3a4   : > { %v2495_v36 = vpop.permute.xlu0 %854  ;;  %v1150_v50 = vpop.permute.xlu1 %1149 }
 0x3a5   : > { %v760_v48 = vsub.f32 %v2389_v5, %v744_v21  ;;  %v1004_v5 = vmul.f32 -0.5, %v988_v31  ;;  %v1115_v41 = vsub.f32 %v1661_v39, %v2304_v10  ;;  %v2817_v39 = vld [vmem:[#allocation14_spill] sm:$0xff] }
 0x3a7   : > { %1175 = vrot.lane.b32.xlu1 %v760_v48, %s1987_s10  ;;  %v1020_v40 = vmul.f32 %v1004_v5, %v988_v31  ;;  %v2523_v55 = vadd.f32 %v1150_v50, %v1115_v41  ;;  %v1021_v48 = vmul.f32 %v1005_v11, %v989_v6  ;;  %v1114_v31 = vsub.f32 %v1660_v20, %v2813_v35  ;;  %v2821_v41 = vld [vmem:[#allocation8_spill] sm:$0xff]  ;;  %v2822_v6 = vld [vmem:[#allocation17_spill] sm:$0xff]  ;;  %v2824_v11 = vld [vmem:[#allocation18_spill] sm:$0xff] }
 0x3a8   : > { %v2504_v33 = vpop.permute.xlu0 %1081  ;;  %v868_v53 = vsub.f32 %v2821_v41, %v2179_v2  ;;  %v2826_v2 = vld [vmem:[#allocation10_spill] sm:$0xff] }
 0x3a9   : > { %v1662_v14 = vadd.f32 -0.9189385, %v1020_v40  ;;  %v1216_v10 = vsel %vm1209_vm2, %v2523_v55, -inf  ;;  %v1663_v58 = vadd.f32 -0.9189385, %v1021_v48  ;;  %v2542_v1 = vadd.f32 %v2481_v32, %v1114_v31  ;;  %v2816_v32 = vld [vmem:[#allocation6_spill] sm:$0xff] }
 0x3aa   : > { %v866_v0 = vsub.f32 %v2817_v39, %v2816_v32  ;;  %v996_v3 = vmul.f32 %v2452_v17, %v868_v53 }
 0x3ab   : > { %v1116_v22 = vsub.f32 %v1662_v14, %v2293_v28  ;;  %v1156_v34 = vpop.permute.xlu1 %1155  ;;  %v1117_v4 = vsub.f32 %v1663_v58, %v2814_v29  ;;  %v1213_v44 = vsel %vm1209_vm2, %v2542_v1, -inf }
 0x3ac   : > { %v2509_v25 = vpop.permute.xlu0 %963  ;;  %v2534_v21 = vadd.f32 %v1156_v34, %v1118_v9  ;;  %v994_v50 = vmul.f32 %v2819_v18, %v866_v0 }
 0x3ad   : > { %v2529_v61 = vadd.f32 %v1152_v63, %v1116_v22  ;;  %v2815_v63 = vld [vmem:[#allocation12_spill] sm:$0xff]  ;;  %v2823_v22 = vld [vmem:[#allocation7_spill] sm:$0xff] }
 0x3ae   : > { %v1225_v28 = vsel %vm1209_vm2, %v2534_v21, -inf  ;;  %v864_v42 = vsub.f32 %v2815_v63, %v2224_v30  ;;  %v1010_v27 = vmul.f32 -0.5, %v994_v50 }
 0x3af   : > { %v1219_v37 = vsel %vm1209_vm2, %v2529_v61, -inf  ;;  %v1154_v38 = vpop.permute.xlu1 %1153 }
 0x3b0   : > { %v2512_v43 = vpop.permute.xlu0 %1085  ;;  %v2545_v5 = vadd.f32 %v1154_v38, %v1117_v4  ;;  %v1026_v48 = vmul.f32 %v1010_v27, %v994_v50 }
 0x3b2   : > { %v1222_v52 = vsel %vm1209_vm2, %v2545_v5, -inf  ;;  %v1668_v29 = vadd.f32 -0.9189385, %v1026_v48 }
 0x3b4   : > { %v1146_v54 = vpop.permute.xlu0 %1145 }
 0x3b5   : > { %v2519_v8 = vadd.f32 %v1146_v54, %v1113_v49  ;;  %v992_v49 = vmul.f32 %v2818_v16, %v864_v42  ;;  %v2820_v54 = vld [vmem:[#allocation13_spill] sm:$0xff] }
 0x3b6   : > { %v865_v14 = vsub.f32 %v2820_v54, %v2164_v60  ;;  %v2825_v60 = vld [vmem:[#allocation9_spill] sm:$0xff] }
 0x3b7   : > { %v1210_v45 = vsel %vm1209_vm2, %v2519_v8, -inf  ;;  %v1008_v26 = vmul.f32 -0.5, %v992_v49  ;;  %v869_v20 = vsub.f32 %v2825_v60, %v2196_v12  ;;  %v1122_v12 = vsub.f32 %v1668_v29, %v2465_v15 }
 0x3b8   : > { %1211 = vmax.xlane.f32.xlu0 %v1210_v45  ;;  %v2553_v40 = vpop.permute.xlu0 %967  ;;  %v993_v30 = vmul.f32 %v2822_v6, %v865_v14 }
 0x3b9   : > { %v1024_v13 = vmul.f32 %v1008_v26, %v992_v49  ;;  %v997_v35 = vmul.f32 %v2457_v19, %v869_v20  ;;  %v2579_v19 = vadd.f32 %v2490_v47, %v1122_v12  ;;  %v1015_v47 = vmul.f32 -0.5, %v2484_v23 }
 0x3ba   : > { %v1009_v9 = vmul.f32 -0.5, %v993_v30 }
 0x3bb   : > { %v1666_v31 = vadd.f32 -0.9189385, %v1024_v13  ;;  %v1013_v63 = vmul.f32 -0.5, %v997_v35  ;;  %v1031_v6 = vmul.f32 %v1015_v47, %v2484_v23 }
 0x3bc   : > { %1217 = vmax.xlane.f32.xlu0 %v1216_v10  ;;  %v1162_v45 = vpop.permute.xlu0 %1161  ;;  %v867_v10 = vsub.f32 %v2823_v22, %v2188_v7 }
 0x3bd   : > { %v1120_v4 = vsub.f32 %v1666_v31, %v2486_v24  ;;  %v1029_v24 = vmul.f32 %v1013_v63, %v997_v35  ;;  %v872_v35 = vsub.f32 %v2495_v36, %v2154_v56 }
 0x3be   : > { %v995_v34 = vmul.f32 %v2824_v11, %v867_v10 }
 0x3bf   : > { %v1671_v59 = vadd.f32 -0.9189385, %v1029_v24  ;;  %v1000_v31 = vmul.f32 %v2553_v40, %v872_v35 }
 0x3c0   : > { %1220 = vmax.xlane.f32.xlu0 %v1219_v37  ;;  %v1012_v37 = vmul.f32 -0.5, %v996_v3  ;;  %v1166_v58 = vpop.permute.xlu0 %1165  ;;  %v1011_v17 = vmul.f32 -0.5, %v995_v34 }
 0x3c2   : > { %v1028_v7 = vmul.f32 %v1012_v37, %v996_v3 }
 0x3c4   : > { %1226 = vmax.xlane.f32.xlu0 %v1225_v28  ;;  %v870_v28 = vsub.f32 %v2826_v2, %v2243_v46  ;;  %v1027_v46 = vmul.f32 %v1011_v17, %v995_v34  ;;  %v1168_v39 = vpop.permute.xlu0 %1167  ;;  %v1670_v0 = vadd.f32 -0.9189385, %v1028_v7  ;;  %v1016_v17 = vmul.f32 -0.5, %v1000_v31 }
 0x3c6   : > { %v998_v38 = vmul.f32 %v2509_v25, %v870_v28  ;;  %v1124_v18 = vsub.f32 %v1670_v0, %v2502_v51  ;;  %v1669_v14 = vadd.f32 -0.9189385, %v1027_v46  ;;  %v1237_v51 = vsel %vm1209_vm2, %v2579_v19, -inf }
 0x3c8   : > { %v1014_v32 = vmul.f32 -0.5, %v998_v38  ;;  %v2593_v41 = vadd.f32 %v1168_v39, %v1124_v18  ;;  %v1123_v62 = vsub.f32 %v1669_v14, %v2512_v43 }
 0x3ca   : > { %v1030_v54 = vmul.f32 %v1014_v32, %v998_v38  ;;  %v1243_v22 = vsel %vm1209_vm2, %v2593_v41, -inf  ;;  %v1032_v38 = vmul.f32 %v1016_v17, %v1000_v31 }
 0x3cb   : > { %1214 = vmax.xlane.f32.xlu1 %v1213_v44  ;;  %v1025_v44 = vmul.f32 %v1009_v9, %v993_v30  ;;  %v1673_v9 = vadd.f32 -0.9189385, %v1031_v6 }
 0x3cc   : > { %v1674_v29 = vadd.f32 -0.9189385, %v1032_v38 }
 0x3cd   : > { %v1667_v16 = vadd.f32 -0.9189385, %v1025_v44 }
 0x3cf   : > { %1223 = vmax.xlane.f32.xlu1 %v1222_v52  ;;  %v1121_v15 = vsub.f32 %v1667_v16, %v2504_v33  ;;  %v1170_v33 = vpop.permute.xlu0 %1169 }
 0x3d1   : > { %v2591_v26 = vadd.f32 %v1162_v45, %v1121_v15  ;;  %v2601_v45 = vadd.f32 %v1166_v58, %v1123_v62 }
 0x3d3   : > { %v1234_v3 = vsel %vm1209_vm2, %v2591_v26, -inf  ;;  %v1172_v11 = vpop.permute.xlu0 %1171  ;;  %v1240_v23 = vsel %vm1209_vm2, %v2601_v45, -inf }
 0x3e4   : > { %v1160_v52 = vpop.permute.xlu1 %1159 }
 0x3e5   : > { %v2576_v42 = vadd.f32 %v1160_v52, %v1120_v4 }
 0x3e7   : > { %v1231_v25 = vsel %vm1209_vm2, %v2576_v42, -inf }
 0x3e8   : > { %v1158_v49 = vpop.permute.xlu1 %1157  ;;  %1232 = vmax.xlane.f32.xlu0 %v1231_v25 }
 0x3e9   : > { %v2588_v50 = vadd.f32 %v1158_v49, %v1119_v57  ;;  %v1672_v57 = vadd.f32 -0.9189385, %v1030_v54 }
 0x3eb   : > { %v1228_v53 = vsel %vm1209_vm2, %v2588_v50, -inf }
 0x3ec   : > { %v1090_v27 = vpop.permute.xlu1 %1089  ;;  %1229 = vmax.xlane.f32.xlu1 %v1228_v53  ;;  %1238 = vmax.xlane.f32.xlu0 %v1237_v51 }
 0x3ed   : > { %v1125_v30 = vsub.f32 %v1671_v59, %v1090_v27 }
 0x3ef   : > { %v2607_v34 = vadd.f32 %v1170_v33, %v1125_v30 }
 0x3f0   : > { %v1092_v10 = vpop.permute.xlu1 %1091  ;;  %1235 = vmax.xlane.f32.xlu1 %v1234_v3  ;;  %1244 = vmax.xlane.f32.xlu0 %v1243_v22 }
 0x3f1   : > { %v1126_v13 = vsub.f32 %v1672_v57, %v1092_v10  ;;  %v1246_v2 = vsel %vm1209_vm2, %v2607_v34, -inf }
 0x3f3   : > { %v2609_v43 = vadd.f32 %v1172_v11, %v1126_v13 }
 0x3f4   : > { %v1094_v37 = vpop.permute.xlu1 %1093  ;;  %1241 = vmax.xlane.f32.xlu1 %v1240_v23 }
 0x3f5   : > { %v1127_v60 = vsub.f32 %v1673_v9, %v1094_v37  ;;  %v1249_v20 = vsel %vm1209_vm2, %v2609_v43, -inf }
 0x3f6   : > { %1250 = vmax.xlane.f32.xlu0 %v1249_v20 }
 0x3f7   : > { %v1174_v48 = vpop.permute.xlu0 %1173 }
 0x3f8   : > { %v2617_v28 = vadd.f32 %v1174_v48, %v1127_v60  ;;  %1247 = vmax.xlane.f32.xlu1 %v1246_v2  ;;  %v1096_v7 = vpop.permute.xlu1 %1095 }
 0x3f9   : > { %v1128_v4 = vsub.f32 %v1674_v29, %v1096_v7 }
 0x3fa   : > { %v1252_v58 = vsel %vm1209_vm2, %v2617_v28, -inf }
 0x3fc   : > { %1253 = vmax.xlane.f32.xlu1 %v1252_v58 }
 0x419   : > { %v1176_v44 = vpop.permute.xlu1 %1175 }
 0x41a   : > { %v2624_v52 = vadd.f32 %v1176_v44, %v1128_v4 }
 0x41c   : > { %v1255_v63 = vsel %vm1209_vm2, %v2624_v52, -inf }
 0x41d   : > { %1256 = vmax.xlane.f32.xlu0 %v1255_v63 }
 0x441   : > { %v2628_v12 = vpop.xlane.xlu0 %1211 }
 0x442   : > { %v1258_v32 = vsub.f32 %v2519_v8, %v2628_v12 }
 0x444   : > { %v1274_v56 = vmul.f32 1.442695, %v1258_v32 }
 0x445   : > { %v2632_v36 = vpop.xlane.xlu0 %1217 }
 0x446   : > { %1884 = vpow2.f32 %v1274_v56  ;;  %v1260_v40 = vsub.f32 %v2523_v55, %v2632_v36 }
 0x448   : > { %v1278_v46 = vmul.f32 1.442695, %v1260_v40 }
 0x449   : > { %v2636_v39 = vpop.xlane.xlu0 %1220 }
 0x44a   : > { %1886 = vpow2.f32 %v1278_v46  ;;  %v1261_v0 = vsub.f32 %v2529_v61, %v2636_v39 }
 0x44c   : > { %v1280_v16 = vmul.f32 1.442695, %v1261_v0 }
 0x44d   : > { %v2640_v25 = vpop.xlane.xlu0 %1226 }
 0x44e   : > { %1888 = vpow2.f32 %v1280_v16  ;;  %v1263_v8 = vsub.f32 %v2534_v21, %v2640_v25 }
 0x450   : > { %v1284_v49 = vmul.f32 1.442695, %v1263_v8 }
 0x452   : > { %1890 = vpow2.f32 %v1284_v49 }
 0x453   : > { %v1885_v24 = vpop.eup %1884 }
 0x454   : > { %v2644_v18 = vpop.xlane.xlu1 %1214  ;;  %1322 = vrot.lane.b32.xlu1 %v1885_v24, %s1986_s9 }
 0x455   : > { %v1259_v55 = vsub.f32 %v2542_v1, %v2644_v18 }
 0x457   : > { %v1887_v15 = vpop.eup %1886  ;;  %v1276_v47 = vmul.f32 1.442695, %v1259_v55 }
 0x458   : > { %v2649_v61 = vpop.xlane.xlu1 %1223  ;;  %1326 = vrot.lane.b32.xlu1 %v1887_v15, %s1986_s9 }
 0x459   : > { %1892 = vpow2.f32 %v1276_v47  ;;  %v1262_v21 = vsub.f32 %v2545_v5, %v2649_v61 }
 0x45b   : > { %v1889_v54 = vpop.eup %1888  ;;  %v1282_v14 = vmul.f32 1.442695, %v1262_v21 }
 0x45c   : > { %1328 = vrot.lane.b32.xlu1 %v1889_v54, %s1986_s9 }
 0x45d   : > { %1894 = vpow2.f32 %v1282_v14 }
 0x45f   : > { %v1891_v53 = vpop.eup %1890 }
 0x460   : > { %1332 = vrot.lane.b32.xlu1 %v1891_v53, %s1986_s9 }
 0x466   : > { %v1893_v51 = vpop.eup %1892 }
 0x467   : > { %1324 = vrot.lane.b32.xlu0 %v1893_v51, %s1986_s9 }
 0x46a   : > { %v1895_v1 = vpop.eup %1894 }
 0x46b   : > { %1330 = vrot.lane.b32.xlu0 %v1895_v1, %s1986_s9 }
 0x471   : > { %v2658_v33 = vpop.xlane.xlu0 %1232 }
 0x472   : > { %v1265_v27 = vsub.f32 %v2576_v42, %v2658_v33 }
 0x474   : > { %v1288_v5 = vmul.f32 1.442695, %v1265_v27 }
 0x475   : > { %v2662_v62 = vpop.xlane.xlu1 %1229  ;;  %v2664_v59 = vpop.xlane.xlu0 %1238 }
 0x476   : > { %1896 = vpow2.f32 %v1288_v5  ;;  %v1264_v57 = vsub.f32 %v2588_v50, %v2662_v62  ;;  %v1267_v6 = vsub.f32 %v2579_v19, %v2664_v59 }
 0x478   : > { %v1286_v30 = vmul.f32 1.442695, %v1264_v57  ;;  %v1292_v3 = vmul.f32 1.442695, %v1267_v6 }
 0x479   : > { %v2670_v22 = vpop.xlane.xlu1 %1235  ;;  %v2672_v10 = vpop.xlane.xlu0 %1244 }
 0x47a   : > { %1898 = vpow2.f32 %v1286_v30  ;;  %v1266_v42 = vsub.f32 %v2591_v26, %v2670_v22  ;;  %v1269_v13 = vsub.f32 %v2593_v41, %v2672_v10 }
 0x47b   : > { %1900 = vpow2.f32 %v1292_v3 }
 0x47c   : > { %v1290_v11 = vmul.f32 1.442695, %v1266_v42  ;;  %v1296_v9 = vmul.f32 1.442695, %v1269_v13 }
 0x47d   : > { %v2678_v50 = vpop.xlane.xlu1 %1241 }
 0x47e   : > { %1902 = vpow2.f32 %v1290_v11  ;;  %v1268_v19 = vsub.f32 %v2601_v45, %v2678_v50 }
 0x47f   : > { %1904 = vpow2.f32 %v1296_v9  ;;  %v2682_v23 = vpop.xlane.xlu0 %1250 }
 0x480   : > { %v1294_v37 = vmul.f32 1.442695, %v1268_v19  ;;  %v1271_v60 = vsub.f32 %v2609_v43, %v2682_v23 }
 0x481   : > { %v2686_v26 = vpop.xlane.xlu1 %1247 }
 0x482   : > { %1906 = vpow2.f32 %v1294_v37  ;;  %v1300_v41 = vmul.f32 1.442695, %v1271_v60  ;;  %v1270_v20 = vsub.f32 %v2607_v34, %v2686_v26 }
 0x483   : > { %v1897_v48 = vpop.eup %1896 }
 0x484   : > { %1908 = vpow2.f32 %v1300_v41  ;;  %v1298_v2 = vmul.f32 1.442695, %v1270_v20  ;;  %1336 = vrot.lane.b32.xlu1 %v1897_v48, %s1986_s9 }
 0x485   : > { %v2691_v45 = vpop.xlane.xlu1 %1253 }
 0x486   : > { %1910 = vpow2.f32 %v1298_v2  ;;  %v1272_v58 = vsub.f32 %v2617_v28, %v2691_v45 }
 0x487   : > { %v1899_v35 = vpop.eup %1898 }
 0x488   : > { %v1901_v43 = vpop.eup %1900  ;;  %v1302_v31 = vmul.f32 1.442695, %v1272_v58  ;;  %1334 = vrot.lane.b32.xlu0 %v1899_v35, %s1986_s9 }
 0x489   : > { %1340 = vrot.lane.b32.xlu1 %v1901_v43, %s1986_s9 }
 0x48a   : > { %1912 = vpow2.f32 %v1302_v31 }
 0x48b   : > { %v1903_v34 = vpop.eup %1902 }
 0x48c   : > { %v1905_v17 = vpop.eup %1904  ;;  %1338 = vrot.lane.b32.xlu0 %v1903_v34, %s1986_s9 }
 0x48d   : > { %1344 = vrot.lane.b32.xlu1 %v1905_v17, %s1986_s9 }
 0x48f   : > { %v1907_v38 = vpop.eup %1906 }
 0x490   : > { %1342 = vrot.lane.b32.xlu0 %v1907_v38, %s1986_s9 }
 0x491   : > { %v1909_v7 = vpop.eup %1908 }
 0x492   : > { %1348 = vrot.lane.b32.xlu1 %v1909_v7, %s1986_s9  ;;  %v2827_v7 = vld [vmem:[#allocation5_spill] sm:$0xff] }
 0x493   : > { %v1911_v28 = vpop.eup %1910 }
 0x494   : > { %1346 = vrot.lane.b32.xlu0 %v1911_v28, %s1986_s9  ;;  %v1485_v28 = vadd.s32 8, %v2827_v7 }
 0x497   : > { %v1913_v29 = vpop.eup %1912 }
 0x498   : > { %1350 = vrot.lane.b32.xlu0 %v1913_v29, %s1986_s9 }
 0x4a6   : > { %v2703_v4 = vpop.xlane.xlu0 %1256 }
 0x4a7   : > { %v1273_v44 = vsub.f32 %v2624_v52, %v2703_v4 }
 0x4a9   : > { %v1304_v63 = vmul.f32 1.442695, %v1273_v44 }
 0x4ab   : > { %1914 = vpow2.f32 %v1304_v63  ;;  %v2726_v63 = vstv %s1675_s11 }
 0x4b8   : > { %v1915_v32 = vpop.eup %1914 }
 0x4b9   : > { %1352 = vrot.lane.b32.xlu1 %v1915_v32, %s1986_s9 }
 0x4c6   : > { %v1323_v56 = vpop.permute.xlu1 %1322 }
 0x4c7   : > { %v1370_v40 = vsel %vm375_vm1, %v1323_v56, 0.0 }
 0x4c8   : > { %1371 = vadd.xlane.f32.xlu0 %v1370_v40  ;;  %v1502_v40 = vadd.s32 %v2726_v63, %v1485_v28 }
 0x4ca   : > { %v1327_v46 = vpop.permute.xlu1 %1326  ;;  %vm1518_vm3 = vcmp.lt.s32.totalorder %v1502_v40, 200 }
 0x4cb   : > { %v1376_v0 = vsel %vm375_vm1, %v1327_v46, 0.0 }
 0x4cc   : > { %1377 = vadd.xlane.f32.xlu0 %v1376_v0 }
 0x4ce   : > { %v1329_v16 = vpop.permute.xlu1 %1328 }
 0x4cf   : > { %v1379_v8 = vsel %vm375_vm1, %v1329_v16, 0.0  ;;  %v1486_v16 = vadd.s32 16, %v2827_v7 }
 0x4d0   : > { %1380 = vadd.xlane.f32.xlu0 %v1379_v8 }
 0x4d2   : > { %v1333_v49 = vpop.permute.xlu1 %1332 }
 0x4d3   : > { %v1385_v52 = vsel %vm375_vm1, %v1333_v49, 0.0  ;;  %v1501_v49 = vadd.s32 %v2726_v63, %v2827_v7 }
 0x4d4   : > { %1386 = vadd.xlane.f32.xlu0 %v1385_v52 }
 0x4d5   : > { %vm1517_vm4 = vcmp.lt.s32.totalorder %v1501_v49, 200 }
 0x4d9   : > { %v1325_v24 = vpop.permute.xlu0 %1324 }
 0x4da   : > { %v1373_v55 = vsel %vm375_vm1, %v1325_v24, 0.0 }
 0x4dd   : > { %1374 = vadd.xlane.f32.xlu1 %v1373_v55  ;;  %v1331_v15 = vpop.permute.xlu0 %1330 }
 0x4de   : > { %v1382_v47 = vsel %vm375_vm1, %v1331_v15, 0.0  ;;  %v1487_v15 = vadd.s32 24, %v2827_v7 }
 0x4e1   : > { %1383 = vadd.xlane.f32.xlu1 %v1382_v47  ;;  %v1503_v47 = vadd.s32 %v2726_v63, %v1486_v16 }
 0x4e3   : > { %vm1519_vm5 = vcmp.lt.s32.totalorder %v1503_v47, 200 }
 0x4f6   : > { %v1337_v21 = vpop.permute.xlu1 %1336 }
 0x4f7   : > { %v1391_v54 = vsel %vm375_vm1, %v1337_v21, 0.0 }
 0x4f8   : > { %1392 = vadd.xlane.f32.xlu0 %v1391_v54 }
 0x4fa   : > { %v1335_v14 = vpop.permute.xlu0 %1334 }
 0x4fb   : > { %v1341_v53 = vpop.permute.xlu1 %1340  ;;  %v1388_v51 = vsel %vm375_vm1, %v1335_v14, 0.0 }
 0x4fc   : > { %v1397_v1 = vsel %vm375_vm1, %v1341_v53, 0.0  ;;  %1389 = vadd.xlane.f32.xlu1 %v1388_v51  ;;  %v1504_v53 = vadd.s32 %v2726_v63, %v1487_v15 }
 0x4fd   : > { %1398 = vadd.xlane.f32.xlu0 %v1397_v1 }
 0x4fe   : > { %v1339_v27 = vpop.permute.xlu0 %1338  ;;  %vm1520_vm6 = vcmp.lt.s32.totalorder %v1504_v53, 200 }
 0x4ff   : > { %v1345_v5 = vpop.permute.xlu1 %1344  ;;  %v1394_v57 = vsel %vm375_vm1, %v1339_v27, 0.0 }
 0x500   : > { %v1403_v6 = vsel %vm375_vm1, %v1345_v5, 0.0  ;;  %1395 = vadd.xlane.f32.xlu1 %v1394_v57 }
 0x501   : > { %1404 = vadd.xlane.f32.xlu0 %v1403_v6 }
 0x502   : > { %v1343_v30 = vpop.permute.xlu0 %1342 }
 0x503   : > { %v1400_v3 = vsel %vm375_vm1, %v1343_v30, 0.0  ;;  %v1488_v30 = vadd.s32 32, %v2827_v7 }
 0x504   : > { %v1349_v42 = vpop.permute.xlu1 %1348  ;;  %1401 = vadd.xlane.f32.xlu1 %v1400_v3 }
 0x505   : > { %v1409_v13 = vsel %vm375_vm1, %v1349_v42, 0.0 }
 0x506   : > { %1410 = vadd.xlane.f32.xlu0 %v1409_v13  ;;  %v1347_v11 = vpop.permute.xlu0 %1346 }
 0x507   : > { %v1406_v9 = vsel %vm375_vm1, %v1347_v11, 0.0 }
 0x508   : > { %1407 = vadd.xlane.f32.xlu1 %v1406_v9 }
 0x50a   : > { %v1351_v19 = vpop.permute.xlu0 %1350 }
 0x50b   : > { %v1412_v37 = vsel %vm375_vm1, %v1351_v19, 0.0 }
 0x50c   : > { %1413 = vadd.xlane.f32.xlu1 %v1412_v37  ;;  %v1489_v37 = vadd.s32 40, %v2827_v7 }
 0x52b   : > { %v1353_v60 = vpop.permute.xlu1 %1352 }
 0x52c   : > { %v1415_v41 = vsel %vm375_vm1, %v1353_v60, 0.0 }
 0x52d   : > { %1416 = vadd.xlane.f32.xlu0 %v1415_v41  ;;  %v1490_v41 = vadd.s32 48, %v2827_v7 }
 0x551   : > { %v1372_v20 = vpop.xlane.xlu0 %1371 }
 0x555   : > { %v1378_v2 = vpop.xlane.xlu0 %1377 }
 0x559   : > { %v1381_v58 = vpop.xlane.xlu0 %1380 }
 0x55d   : > { %v1387_v31 = vpop.xlane.xlu0 %1386 }
 0x566   : > { %v1375_v48 = vpop.xlane.xlu1 %1374 }
 0x567   : > { %1916 = vlog2.f32 %v1375_v48 }
 0x568   : > { %1918 = vlog2.f32 %v1372_v20 }
 0x569   : > { %1920 = vlog2.f32 %v1378_v2 }
 0x56a   : > { %1922 = vlog2.f32 %v1381_v58  ;;  %v1384_v35 = vpop.xlane.xlu1 %1383 }
 0x56b   : > { %1924 = vlog2.f32 %v1384_v35 }
 0x56c   : > { %1926 = vlog2.f32 %v1387_v31 }
 0x574   : > { %v1917_v43 = vpop.eup %1916 }
 0x575   : > { %v1919_v34 = vpop.eup %1918  ;;  %v1421_v38 = vmul.f32 0.6931472, %v1917_v43 }
 0x576   : > { %v1921_v29 = vpop.eup %1920  ;;  %v1419_v44 = vmul.f32 0.6931472, %v1919_v34 }
 0x577   : > { %v1451_v32 = vadd.f32 %v1421_v38, %v2644_v18  ;;  %v1423_v56 = vmul.f32 0.6931472, %v1921_v29  ;;  %v1923_v8 = vpop.eup %1922 }
 0x578   : > { %v1450_v0 = vadd.f32 %v1419_v44, %v2628_v12  ;;  %v1425_v21 = vmul.f32 0.6931472, %v1923_v8  ;;  %v1925_v12 = vpop.eup %1924  ;;  %v1491_v44 = vadd.s32 56, %v2827_v7 }
 0x579   : > { %v1467_v24 = vsub.f32 0.0, %v1451_v32  ;;  %v1452_v55 = vadd.f32 %v1423_v56, %v2632_v36  ;;  %v1927_v1 = vpop.eup %1926  ;;  %v1427_v5 = vmul.f32 0.6931472, %v1925_v12 }
 0x57a   : > { %v1466_v18 = vsub.f32 0.0, %v1450_v0  ;;  %v1453_v36 = vadd.f32 %v1425_v21, %v2636_v39  ;;  %v1429_v13 = vmul.f32 0.6931472, %v1927_v1  ;;  %v1505_v39 = vadd.s32 %v2726_v63, %v1488_v30 }
 0x57b   : > { %v1534_v54 = vsel %vm1518_vm3, %v1467_v24, 0.0  ;;  %v1468_v14 = vsub.f32 0.0, %v1452_v55  ;;  %v1454_v9 = vadd.f32 %v1427_v5, %v2649_v61  ;;  %v1506_v61 = vadd.s32 %v2726_v63, %v1489_v37 }
 0x57c   : > { %v1533_v27 = vsel %vm1517_vm4, %v1466_v18, 0.0  ;;  %v1469_v11 = vsub.f32 0.0, %v1453_v36  ;;  %v1455_v48 = vadd.f32 %v1429_v13, %v2640_v25  ;;  %vm1521_vm7 = vcmp.lt.s32.totalorder %v1505_v39, 200 }
 0x57d   : > { %v1550_v6 = vadd.f32 %v1534_v54, %v1533_v27  ;;  %v1535_v42 = vsel %vm1519_vm5, %v1468_v14, 0.0  ;;  %v1470_v35 = vsub.f32 0.0, %v1454_v9  ;;  %vm1522_vm8 = vcmp.lt.s32.totalorder %v1506_v61, 200 }
 0x57e   : > { %v1536_v58 = vsel %vm1520_vm6, %v1469_v11, 0.0  ;;  %v1471_v29 = vsub.f32 0.0, %v1455_v48  ;;  %v1508_v16 = vadd.s32 %v2726_v63, %v1491_v44  ;;  %v1495_v9 = vadd.s32 88, %v2827_v7 }
 0x57f   : > { %v1551_v60 = vadd.f32 %v1550_v6, %v1535_v42  ;;  %v1537_v32 = vsel %vm1521_vm7, %v1470_v35, 0.0  ;;  %vm1573_vm3 = vcmask 0  }
 0x580   : > { %v1538_v49 = vsel %vm1522_vm8, %v1471_v29, 0.0  ;;  %vm1524_vm10 = vcmp.lt.s32.totalorder %v1508_v16, 200 }
 0x581   : > { %v1393_v46 = vpop.xlane.xlu0 %1392  ;;  %v1552_v34 = vadd.f32 %v1551_v60, %v1536_v58 }
 0x583   : > { %v1553_v40 = vadd.f32 %v1552_v34, %v1537_v32 }
 0x585   : > { %v1390_v17 = vpop.xlane.xlu1 %1389  ;;  %v1554_v15 = vadd.f32 %v1553_v40, %v1538_v49 }
 0x586   : > { %1928 = vlog2.f32 %v1390_v17  ;;  %v1399_v51 = vpop.xlane.xlu0 %1398  ;;  %v1507_v17 = vadd.s32 %v2726_v63, %v1490_v41 }
 0x587   : > { %1930 = vlog2.f32 %v1393_v46 }
 0x588   : > { %vm1523_vm9 = vcmp.lt.s32.totalorder %v1507_v17, 200  ;;  %v1497_v17 = vadd.s32 104, %v2827_v7 }
 0x589   : > { %v1396_v52 = vpop.xlane.xlu1 %1395 }
 0x58a   : > { %1932 = vlog2.f32 %v1396_v52  ;;  %v1405_v2 = vpop.xlane.xlu0 %1404 }
 0x58b   : > { %1934 = vlog2.f32 %v1399_v51  ;;  %v1494_v51 = vadd.s32 80, %v2827_v7 }
 0x58d   : > { %v1402_v3 = vpop.xlane.xlu1 %1401 }
 0x58e   : > { %1936 = vlog2.f32 %v1402_v3  ;;  %v1511_v3 = vadd.s32 %v2726_v63, %v1494_v51 }
 0x58f   : > { %1938 = vlog2.f32 %v1405_v2  ;;  %v1411_v8 = vpop.xlane.xlu0 %1410 }
 0x590   : > { %vm1527_vm13 = vcmp.lt.s32.totalorder %v1511_v3, 200 }
 0x591   : > { %v1408_v38 = vpop.xlane.xlu1 %1407 }
 0x592   : > { %1940 = vlog2.f32 %v1408_v38 }
 0x593   : > { %v1929_v57 = vpop.eup %1928  ;;  %1942 = vlog2.f32 %v1411_v8 }
 0x594   : > { %v1431_v19 = vmul.f32 0.6931472, %v1929_v57  ;;  %v1931_v20 = vpop.eup %1930 }
 0x595   : > { %v1433_v28 = vmul.f32 0.6931472, %v1931_v20  ;;  %v1414_v47 = vpop.xlane.xlu1 %1413 }
 0x596   : > { %v1456_v43 = vadd.f32 %v1431_v19, %v2662_v62  ;;  %v1492_v62 = vadd.s32 64, %v2827_v7  ;;  %1944 = vlog2.f32 %v1414_v47 }
 0x597   : > { %v1933_v31 = vpop.eup %1932  ;;  %v1457_v46 = vadd.f32 %v1433_v28, %v2658_v33  ;;  %v1493_v33 = vadd.s32 72, %v2827_v7  ;;  %v1498_v28 = vadd.s32 112, %v2827_v7 }
 0x598   : > { %v1472_v25 = vsub.f32 0.0, %v1456_v43  ;;  %v1435_v56 = vmul.f32 0.6931472, %v1933_v31  ;;  %v1935_v0 = vpop.eup %1934  ;;  %v1509_v18 = vadd.s32 %v2726_v63, %v1492_v62  ;;  %v1499_v62 = vadd.s32 120, %v2827_v7 }
 0x599   : > { %v1473_v21 = vsub.f32 0.0, %v1457_v46  ;;  %v1437_v12 = vmul.f32 0.6931472, %v1935_v0  ;;  %v1510_v36 = vadd.s32 %v2726_v63, %v1493_v33  ;;  %v1515_v40 = vadd.s32 %v2726_v63, %v1498_v28 }
 0x59a   : > { %v1539_v52 = vsel %vm1523_vm9, %v1472_v25, 0.0  ;;  %v1458_v24 = vadd.f32 %v1435_v56, %v2670_v22  ;;  %vm1525_vm11 = vcmp.lt.s32.totalorder %v1509_v18, 200  ;;  %v1516_v49 = vadd.s32 %v2726_v63, %v1499_v62 }
 0x59b   : > { %v1937_v55 = vpop.eup %1936  ;;  %v1555_v54 = vadd.f32 %v1554_v15, %v1539_v52  ;;  %v1540_v1 = vsel %vm1524_vm10, %v1473_v21, 0.0  ;;  %v1459_v22 = vadd.f32 %v1437_v12, %v2664_v59  ;;  %vm1526_vm12 = vcmp.lt.s32.totalorder %v1510_v36, 200 }
 0x59c   : > { %v1474_v14 = vsub.f32 0.0, %v1458_v24  ;;  %v1439_v53 = vmul.f32 0.6931472, %v1937_v55  ;;  %v1939_v27 = vpop.eup %1938  ;;  %v1496_v59 = vadd.s32 96, %v2827_v7  ;;  %vm1531_vm1 = vcmp.lt.s32.totalorder %v1515_v40, 200 }
 0x59d   : > { %v1556_v5 = vadd.f32 %v1555_v54, %v1540_v1  ;;  %v1475_v42 = vsub.f32 0.0, %v1459_v22  ;;  %v1441_v13 = vmul.f32 0.6931472, %v1939_v27  ;;  %vm1532_vm2 = vcmp.lt.s32.totalorder %v1516_v49, 200 }
 0x59e   : > { %v1541_v57 = vsel %vm1525_vm11, %v1474_v14, 0.0  ;;  %v1460_v6 = vadd.f32 %v1439_v53, %v2678_v50  ;;  %v1512_v50 = vadd.s32 %v2726_v63, %v1495_v9  ;;  %v1513_v43 = vadd.s32 %v2726_v63, %v1496_v59 }
 0x59f   : > { %v1941_v30 = vpop.eup %1940  ;;  %v1557_v11 = vadd.f32 %v1556_v5, %v1541_v57  ;;  %v1542_v60 = vsel %vm1526_vm12, %v1475_v42, 0.0  ;;  %v1461_v39 = vadd.f32 %v1441_v13, %v2672_v10 }
 0x5a0   : > { %v1476_v19 = vsub.f32 0.0, %v1460_v6  ;;  %v1443_v37 = vmul.f32 0.6931472, %v1941_v30  ;;  %v1943_v41 = vpop.eup %1942  ;;  %vm1528_vm14 = vcmp.lt.s32.totalorder %v1512_v50, 200  ;;  %vm1529_vm15 = vcmp.lt.s32.totalorder %v1513_v43, 200 }
 0x5a1   : > { %v1558_v20 = vadd.f32 %v1557_v11, %v1542_v60  ;;  %v1477_v31 = vsub.f32 0.0, %v1461_v39  ;;  %v1445_v61 = vmul.f32 0.6931472, %v1943_v41 }
 0x5a2   : > { %v1543_v2 = vsel %vm1527_vm13, %v1476_v19, 0.0  ;;  %v1462_v58 = vadd.f32 %v1443_v37, %v2686_v26  ;;  %v1514_v26 = vadd.s32 %v2726_v63, %v1497_v17  ;;  %v1549_v63 = vld [vmem:[#allocation2] sm:$0x1] }
 0x5a3   : > { %v1945_v35 = vpop.eup %1944  ;;  %v1559_v34 = vadd.f32 %v1558_v20, %v1543_v2  ;;  %v1544_v29 = vsel %vm1528_vm14, %v1477_v31, 0.0  ;;  %v1463_v44 = vadd.f32 %v1445_v61, %v2682_v23 }
 0x5a4   : > { %v1478_v38 = vsub.f32 0.0, %v1462_v58  ;;  %v1447_v10 = vmul.f32 0.6931472, %v1945_v35  ;;  %vm1530_vm0 = vcmp.lt.s32.totalorder %v1514_v26, 200 }
 0x5a5   : > { %v1560_v32 = vadd.f32 %v1559_v34, %v1544_v29  ;;  %v1479_v46 = vsub.f32 0.0, %v1463_v44 }
 0x5a6   : > { %v1545_v25 = vsel %vm1529_vm15, %v1478_v38, 0.0  ;;  %v1464_v56 = vadd.f32 %v1447_v10, %v2691_v45 }
 0x5a7   : > { %v1561_v0 = vadd.f32 %v1560_v32, %v1545_v25  ;;  %v1546_v52 = vsel %vm1530_vm0, %v1479_v46, 0.0 }
 0x5a8   : > { %v1480_v16 = vsub.f32 0.0, %v1464_v56 }
 0x5a9   : > { %v1562_v24 = vadd.f32 %v1561_v0, %v1546_v52 }
 0x5aa   : > { %v1547_v55 = vsel %vm1531_vm1, %v1480_v16, 0.0 }
 0x5ab   : > { %v1563_v18 = vadd.f32 %v1562_v24, %v1547_v55 }
 0x5b6   : > { %v1417_v48 = vpop.xlane.xlu0 %1416 }
 0x5b7   : > { %1946 = vlog2.f32 %v1417_v48 }
 0x5c4   : > { %v1947_v8 = vpop.eup %1946 }
 0x5c5   : > { %v1449_v23 = vmul.f32 0.6931472, %v1947_v8 }
 0x5c7   : > { %v1465_v15 = vadd.f32 %v1449_v23, %v2703_v4 }
 0x5c9   : > { %v1481_v45 = vsub.f32 0.0, %v1465_v15 }
 0x5cb   : > { %v1548_v47 = vsel %vm1532_vm2, %v1481_v45, 0.0 }
 0x5cc   : > { %v1564_v7 = vadd.f32 %v1563_v18, %v1548_v47 }
 0x5ce   : > { %v1565_v21 = vrot.slane %v1564_v7, 4 }
 0x5d0   : > { %v1566_v12 = vadd.f32 %v1565_v21, %v1564_v7 }
 0x5d2   : > { %v1567_v54 = vrot.slane %v1566_v12, 2 }
 0x5d4   : > { %v1568_v33 = vadd.f32 %v1567_v54, %v1566_v12 }
 0x5d6   : > { %v1569_v14 = vrot.slane %v1568_v33, 1 }
 0x5d8   : > { %v1570_v53 = vadd.f32 %v1569_v14, %v1568_v33 }
 0x5da   : > { %v1571_v51 = vmul.f32 0.005, %v1570_v53 }
 0x5dc   : > { %v1572_v4 = vadd.f32 %v1571_v51, %v1549_v63 }
 0x5de   : > { %1574 = vst.msk [vmem:[#allocation2] sm:$0x1] %vm1573_vm3, %v1572_v4 }
 0x5df   : > { %1961 = shalt.err (!%p1958_p12)
}
 0x5e0   : > { %1736 = dma.vmem_to_hbm [thread:$0]  (%p1739_p5), %s1583_s13, 16, %s2794_s4, [#allocation3]  }
 0x5e1   : > { %1977 = dma.done.wait (%p1739_p5), [#allocation3], 16  }
 0x5e2   : > { %1979 = vsyncadd (%p1739_p5), [#allocation3], 4294967280 }
 0x5e3 PF: > { %s15_s15 = sadd.s32 1, %s1982_s15  }
 0x5e4   : > { %p12_p13 = scmp.ge.s32.totalorder %s15_s15, 4  }
 0x5e6   :  { %14 = sbr.rel (!%p12_p13) target bundleno = 1 (0x1), region = 70 }
 0x5eb   :  { %1595 = vsyncpa [#allocation3], 1 }
 0x5ec   :  { %1597 = vsyncpa [#allocation3 + $0x1], 1 }

</bundles_post_ra>
